<compile_context>
chip_gen: v7x
topology: tpu7x:2x2x1
jax: 0.10.0
libtpu: 0.0.40
codegen_flags: <defaults>
</compile_context>

<pallas_src>
import math

import numpy as np
import jax
import jax.numpy as jnp
from jax.experimental import pallas as pl
from jax.experimental.pallas import tpu as pltpu

FREQS = 1.0
EPS = 1e-5


def make_config(channels, window, num_classes):
    """Replicates DeepFFT.__init__ layer construction."""
    num_freq = int(window * FREQS)
    num_layers = int(max(math.log2(window) - 1, 2))
    stride = 2
    layer_dims = []
    L = num_freq
    for i in range(0, 2 * num_layers, 2):
        i = 1 if i == 0 else i
        if window < 8 and i == 2:
            stride = 1
        if i <= 4:
            cin, cout = i * channels, 2 * i * channels
        else:
            cin, cout = 8 * channels, 8 * channels
        lout = (L + 2 * 1 - 3) // stride + 1          # conv1d k=3, pad=1
        layer_dims.append((cin, cout, L, lout, stride))
        L = lout
    l_final = 2 if window > 8 else 1
    assert L == l_final, "CNN output length inconsistent with fc; need FREQS=1.0"
    fc_in = 8 * l_final * channels
    assert fc_in == layer_dims[-1][1] * L
    return dict(channels=channels, window=window, num_classes=num_classes,
                num_freq=num_freq, layer_dims=layer_dims, l_final=L, fc_in=fc_in)


def init_params(cfg, key):
    """Deterministic synthetic parameters (shapes match the PyTorch module)."""
    params = dict(layers=[])
    for (cin, cout, lin, lout, stride) in cfg["layer_dims"]:
        key, k1, k2, k3, k4 = jax.random.split(key, 5)
        w = jax.random.normal(k1, (cout, cin, 3), jnp.float32) / np.sqrt(cin * 3)
        b = 0.1 * jax.random.normal(k2, (cout,), jnp.float32)
        g = 1.0 + 0.1 * jax.random.normal(k3, (cout,), jnp.float32)   # BN weight
        bt = 0.1 * jax.random.normal(k4, (cout,), jnp.float32)        # BN bias
        params["layers"].append((w, b, g, bt))
    key, k1, k2 = jax.random.split(key, 3)
    params["fc_w"] = (jax.random.normal(k1, (cfg["num_classes"], cfg["fc_in"]),
                                        jnp.float32) / np.sqrt(cfg["fc_in"]))
    params["fc_b"] = 0.1 * jax.random.normal(k2, (cfg["num_classes"],), jnp.float32)
    return params


def _build_kernel(B, C, cfg):
    layer_dims = cfg["layer_dims"]
    Lf = cfg["l_final"]

    def kernel(x_ref, dcos_ref, dsin_ref, sel_ref, w_ref, bn_ref,
               fcw_ref, fcp_ref, fcb_ref, out_ref):
        # ---- FFT magnitude: two batched DFT matmuls over all B*C rows ----
        xm = x_ref[...]                                              # (B*C, W) bf16
        xr = jnp.dot(xm, dcos_ref[...], preferred_element_type=jnp.float32)
        xi = jnp.dot(xm, dsin_ref[...], preferred_element_type=jnp.float32)
        mag = jnp.sqrt(xr * xr + xi * xi)                            # (B*C, F) f32

        # One-time re-layout (B*C, F) -> (C, B*F): channels on sublanes,
        # batch-major length on lanes for the whole CNN/BN/FC pipeline.
        feats = jnp.concatenate(
            [mag[b * C:(b + 1) * C, :] for b in range(B)], axis=1
        ).astype(jnp.bfloat16)                                       # (C, B*F)

        # ---- conv stack: Conv1d(k=3, pad=1, stride) + BatchNorm1d + ReLU ----
        for li, (cin, cout, lin, lout, stride) in enumerate(layer_dims):
            blin, blout = B * lin, B * lout
            # im2col: one gather matmul per tap covers every batch at once
            # (sel is a host-built 0/1 operator, block-diagonal over batch).
            cols = [
                jnp.dot(feats, sel_ref[li, k, :blin, :blout],
                        preferred_element_type=jnp.float32)
                for k in range(3)
            ]
            im2col = jnp.concatenate(cols, axis=0).astype(jnp.bfloat16)  # (3*cin, B*lout)
            w = w_ref[li, :cout, :3 * cin]                           # (cout, 3*cin) bf16
            y = jnp.dot(w, im2col, preferred_element_type=jnp.float32)
            y = y + bn_ref[li, :cout, 0:1]                           # conv bias

            # BatchNorm1d(track_running_stats=False): biased batch statistics
            # over (batch, length) per channel; two-pass variance, all f32.
            mean = jnp.mean(y, axis=1, keepdims=True)                # (cout, 1)
            var = jnp.mean(jnp.square(y - mean), axis=1, keepdims=True)
            inv = jax.lax.rsqrt(var + EPS)
            scale = bn_ref[li, :cout, 1:2] * inv                     # gamma * inv
            shift = bn_ref[li, :cout, 2:3] - mean * scale            # beta - mean*scale
            feats = jnp.maximum(y * scale + shift, 0.0).astype(jnp.bfloat16)

        # ---- Linear head: gather the (b, l) lanes, one matmul, one store ----
        g = jnp.concatenate(
            [jnp.dot(feats, fcp_ref[l], preferred_element_type=jnp.float32)
             for l in range(Lf)], axis=0).astype(jnp.bfloat16)       # (Lf*cout, B)
        out_ref[...] = (jnp.dot(fcw_ref[...], g,
                                preferred_element_type=jnp.float32)
                        + fcb_ref[...])                              # (nc, B)

    return kernel


def deepfft_pallas(x, params, cfg):
    B, C, W = x.shape
    F = cfg["num_freq"]
    layer_dims = cfg["layer_dims"]
    Lf = cfg["l_final"]
    nc = cfg["num_classes"]
    n_layers = len(layer_dims)
    assert C == cfg["channels"] and W == cfg["window"]

    # ---- host-side (numpy) constant operators ----
    # DFT matrices: X[k] = sum_n x[n] * exp(-2*pi*i*n*k/W), stored bf16.
    n_idx = np.arange(W, dtype=np.float64)[:, None]
    k_idx = np.arange(F, dtype=np.float64)[None, :]
    ang = 2.0 * np.pi * n_idx * k_idx / W
    dcos = jnp.asarray(np.cos(ang), jnp.bfloat16)                  # (W, F)
    dsin = jnp.asarray(-np.sin(ang), jnp.bfloat16)                 # (W, F)

    # Pad+stride gather operators, block-diagonal over batch, packed per
    # layer/tap: sel[li, k, b*lin + j, b*lout + t] = 1  iff  j == stride*t+k-1.
    max_cout = max(d[1] for d in layer_dims)
    max_cin = max(d[0] for d in layer_dims)
    sel_r = B * max(d[2] for d in layer_dims)
    sel_c = B * max(d[3] for d in layer_dims)
    sel_np = np.zeros((n_layers, 3, sel_r, sel_c), np.float32)
    for li, (cin, cout, lin, lout, stride) in enumerate(layer_dims):
        for k in range(3):
            for b in range(B):
                for t in range(lout):
                    j = stride * t + (k - 1)
                    if 0 <= j < lin:
                        sel_np[li, k, b * lin + j, b * lout + t] = 1.0
    sel_all = jnp.asarray(sel_np, jnp.bfloat16)

    # Stacked conv tap weights (cout, 3*cin) and packed bias/gamma/beta.
    w_np = np.zeros((n_layers, max_cout, 3 * max_cin), np.float32)
    bn_np = np.zeros((n_layers, max_cout, 3), np.float32)
    for li, ((w, b, g, bt), (cin, cout, lin, lout, stride)) in enumerate(
            zip(params["layers"], layer_dims)):
        wk = np.asarray(w)                                         # (cout, cin, 3)
        w_np[li, :cout, :3 * cin] = wk.transpose(0, 2, 1).reshape(cout, 3 * cin)
        bn_np[li, :cout, 0] = np.asarray(b)
        bn_np[li, :cout, 1] = np.asarray(g)
        bn_np[li, :cout, 2] = np.asarray(bt)
    w_all = jnp.asarray(w_np, jnp.bfloat16)
    bn_all = jnp.asarray(bn_np, jnp.float32)

    # FC: rearrange so column l*cout+co matches the kernel's (l, co) row
    # stacking of the PyTorch row-major flatten (feature index co*Lf + l).
    cout_last = layer_dims[-1][1]
    fc_w = np.asarray(params["fc_w"])                              # (nc, cout_last*Lf)
    fc_wr = jnp.asarray(
        fc_w.reshape(nc, cout_last, Lf).transpose(0, 2, 1).reshape(nc, Lf * cout_last),
        jnp.bfloat16)
    fcp_np = np.zeros((Lf, B * Lf, B), np.float32)                 # lane gather for FC
    for l in range(Lf):
        for b in range(B):
            fcp_np[l, b * Lf + l, b] = 1.0
    fc_p = jnp.asarray(fcp_np, jnp.bfloat16)
    fc_b = jnp.asarray(np.asarray(params["fc_b"])[:, None], jnp.float32)   # (nc, 1)

    x2d = x.reshape(B * C, W).astype(jnp.bfloat16)

    inputs = (x2d, dcos, dsin, sel_all, w_all, bn_all, fc_wr, fc_p, fc_b)
    out = pl.pallas_call(
        _build_kernel(B, C, cfg),
        out_shape=jax.ShapeDtypeStruct((nc, B), jnp.float32),
        in_specs=[pl.BlockSpec(memory_space=pltpu.MemorySpace.VMEM)] * len(inputs),
        out_specs=pl.BlockSpec(memory_space=pltpu.MemorySpace.VMEM),
        compiler_params=pltpu.CompilerParams(vmem_limit_bytes=32 * 1024 * 1024),
    )(*inputs)
    return out.T                                                   # (B, num_classes)


def deepfft_reference(x, params, cfg):
    """Pure-JAX (f32) reference matching the PyTorch forward semantics."""
    B, C, W = x.shape
    F = cfg["num_freq"]
    fr = jnp.fft.fft(x, axis=-1)
    h = jnp.abs(fr[:, :, :F]).astype(jnp.float32)
    for (w, b, g, bt), (cin, cout, lin, lout, stride) in zip(params["layers"],
                                                             cfg["layer_dims"]):
        y = jax.lax.conv_general_dilated(
            h, w, window_strides=(stride,), padding=((1, 1),),
            dimension_numbers=("NCH", "OIH", "NCH"))
        y = y + b[None, :, None]
        mean = jnp.mean(y, axis=(0, 2), keepdims=True)
        var = jnp.mean(jnp.square(y - mean), axis=(0, 2), keepdims=True)
        y = (y - mean) / jnp.sqrt(var + EPS) * g[None, :, None] + bt[None, :, None]
        h = jnp.maximum(y, 0.0)
    feat = h.reshape(B, -1)
    return feat @ params["fc_w"].T + params["fc_b"]


if __name__ == "__main__":
    # Small shapes: batch=2, channels=8, window=16, num_classes=2.
    # (channels=8 keeps every channel count a multiple of the 8-sublane granule.)
    channels, window, num_classes, B = 8, 16, 2, 2
    cfg = make_config(channels, window, num_classes)

    key = jax.random.PRNGKey(0)
    key, xkey = jax.random.split(key)
    params = init_params(cfg, key)
    x = jax.random.normal(xkey, (B, channels, window), jnp.float32)

    out = jax.block_until_ready(deepfft_pallas(x, params, cfg))

    ref = deepfft_reference(x, params, cfg)
    # Tolerance reflects bf16 MXU operands end-to-end (per performance review);
    # the f32-operand variant of this kernel matched at 2e-2.  Accumulation,
    # magnitude sqrt and BatchNorm statistics remain f32.
    np.testing.assert_allclose(np.asarray(out), np.asarray(ref), rtol=5e-2, atol=5e-2)
    print("KERNEL_OK")
</pallas_src>

<mosaic_0001>
module attributes {stable_mosaic.version = 11 : i64} {
  func.func @kernel(%arg0: memref<16x16xbf16, #tpu.memory_space<vmem>>, %arg1: memref<16x16xbf16, #tpu.memory_space<vmem>>, %arg2: memref<16x16xbf16, #tpu.memory_space<vmem>>, %arg3: memref<3x3x32x16xbf16, #tpu.memory_space<vmem>>, %arg4: memref<3x64x96xbf16, #tpu.memory_space<vmem>>, %arg5: memref<3x64x3xf32, #tpu.memory_space<vmem>>, %arg6: memref<2x128xbf16, #tpu.memory_space<vmem>>, %arg7: memref<2x4x2xbf16, #tpu.memory_space<vmem>>, %arg8: memref<2x1xf32, #tpu.memory_space<vmem>>, %arg9: memref<2x2xf32, #tpu.memory_space<vmem>>) attributes {dimension_semantics = [], scalar_prefetch = 0 : i64, scratch_operands = 0 : i64, tpu.core_type = #tpu.core_type<tc>} {
    %c0 = arith.constant 0 : index
    %c0_0 = arith.constant 0 : index
    %0 = vector.load %arg0[%c0, %c0_0] : memref<16x16xbf16, #tpu.memory_space<vmem>>, vector<16x16xbf16>
    %c0_1 = arith.constant 0 : index
    %c0_2 = arith.constant 0 : index
    %1 = vector.load %arg1[%c0_1, %c0_2] : memref<16x16xbf16, #tpu.memory_space<vmem>>, vector<16x16xbf16>
    %cst = arith.constant dense<0.000000e+00> : vector<16x16xf32>
    %2 = tpu.matmul %0, %1, %cst {dimension_numbers = #tpu.dot_dimension_numbers<[1], [0], [0], [1], [0, 0, 1, 1], [], []>} : vector<16x16xbf16>, vector<16x16xbf16>, vector<16x16xf32> -> vector<16x16xf32>
    %c0_3 = arith.constant 0 : index
    %c0_4 = arith.constant 0 : index
    %3 = vector.load %arg2[%c0_3, %c0_4] : memref<16x16xbf16, #tpu.memory_space<vmem>>, vector<16x16xbf16>
    %cst_5 = arith.constant dense<0.000000e+00> : vector<16x16xf32>
    %4 = tpu.matmul %0, %3, %cst_5 {dimension_numbers = #tpu.dot_dimension_numbers<[1], [0], [0], [1], [0, 0, 1, 1], [], []>} : vector<16x16xbf16>, vector<16x16xbf16>, vector<16x16xf32> -> vector<16x16xf32>
    %5 = arith.mulf %2, %2 : vector<16x16xf32>
    %6 = arith.mulf %4, %4 : vector<16x16xf32>
    %7 = arith.addf %5, %6 : vector<16x16xf32>
    %8 = math.sqrt %7 : vector<16x16xf32>
    %9 = vector.extract_strided_slice %8 {offsets = [0, 0], sizes = [8, 16], strides = [1, 1]} : vector<16x16xf32> to vector<8x16xf32>
    %10 = vector.extract_strided_slice %8 {offsets = [8, 0], sizes = [8, 16], strides = [1, 1]} : vector<16x16xf32> to vector<8x16xf32>
    %11 = tpu.concatenate %9, %10 in 1 : vector<8x16xf32>, vector<8x16xf32> -> vector<8x32xf32>
    %12 = arith.truncf %11 : vector<8x32xf32> to vector<8x32xbf16>
    %c0_6 = arith.constant 0 : index
    %c0_7 = arith.constant 0 : index
    %c0_8 = arith.constant 0 : index
    %c0_9 = arith.constant 0 : index
    %13 = vector.load %arg3[%c0_6, %c0_7, %c0_8, %c0_9] : memref<3x3x32x16xbf16, #tpu.memory_space<vmem>>, vector<1x1x32x16xbf16>
    %14 = vector.shape_cast %13 : vector<1x1x32x16xbf16> to vector<32x16xbf16>
    %cst_10 = arith.constant dense<0.000000e+00> : vector<8x16xf32>
    %15 = tpu.matmul %12, %14, %cst_10 {dimension_numbers = #tpu.dot_dimension_numbers<[1], [0], [0], [1], [0, 0, 1, 1], [], []>} : vector<8x32xbf16>, vector<32x16xbf16>, vector<8x16xf32> -> vector<8x16xf32>
    %c0_11 = arith.constant 0 : index
    %c1 = arith.constant 1 : index
    %c0_12 = arith.constant 0 : index
    %c0_13 = arith.constant 0 : index
    %16 = vector.load %arg3[%c0_11, %c1, %c0_12, %c0_13] : memref<3x3x32x16xbf16, #tpu.memory_space<vmem>>, vector<1x1x32x16xbf16>
    %17 = vector.shape_cast %16 : vector<1x1x32x16xbf16> to vector<32x16xbf16>
    %cst_14 = arith.constant dense<0.000000e+00> : vector<8x16xf32>
    %18 = tpu.matmul %12, %17, %cst_14 {dimension_numbers = #tpu.dot_dimension_numbers<[1], [0], [0], [1], [0, 0, 1, 1], [], []>} : vector<8x32xbf16>, vector<32x16xbf16>, vector<8x16xf32> -> vector<8x16xf32>
    %c0_15 = arith.constant 0 : index
    %c2 = arith.constant 2 : index
    %c0_16 = arith.constant 0 : index
    %c0_17 = arith.constant 0 : index
    %19 = vector.load %arg3[%c0_15, %c2, %c0_16, %c0_17] : memref<3x3x32x16xbf16, #tpu.memory_space<vmem>>, vector<1x1x32x16xbf16>
    %20 = vector.shape_cast %19 : vector<1x1x32x16xbf16> to vector<32x16xbf16>
    %cst_18 = arith.constant dense<0.000000e+00> : vector<8x16xf32>
    %21 = tpu.matmul %12, %20, %cst_18 {dimension_numbers = #tpu.dot_dimension_numbers<[1], [0], [0], [1], [0, 0, 1, 1], [], []>} : vector<8x32xbf16>, vector<32x16xbf16>, vector<8x16xf32> -> vector<8x16xf32>
    %22 = tpu.concatenate %15, %18, %21 in 0 : vector<8x16xf32>, vector<8x16xf32>, vector<8x16xf32> -> vector<24x16xf32>
    %23 = arith.truncf %22 : vector<24x16xf32> to vector<24x16xbf16>
    %c0_19 = arith.constant 0 : index
    %c0_20 = arith.constant 0 : index
    %c0_21 = arith.constant 0 : index
    %24 = vector.load %arg4[%c0_19, %c0_20, %c0_21] : memref<3x64x96xbf16, #tpu.memory_space<vmem>>, vector<1x16x24xbf16>
    %25 = vector.shape_cast %24 : vector<1x16x24xbf16> to vector<16x24xbf16>
    %cst_22 = arith.constant dense<0.000000e+00> : vector<16x16xf32>
    %26 = tpu.matmul %25, %23, %cst_22 {dimension_numbers = #tpu.dot_dimension_numbers<[1], [0], [0], [1], [0, 0, 1, 1], [], []>} : vector<16x24xbf16>, vector<24x16xbf16>, vector<16x16xf32> -> vector<16x16xf32>
    %c0_23 = arith.constant 0 : index
    %c0_24 = arith.constant 0 : index
    %c0_25 = arith.constant 0 : index
    %27 = vector.load %arg5[%c0_23, %c0_24, %c0_25] : memref<3x64x3xf32, #tpu.memory_space<vmem>>, vector<1x16x1xf32>
    %28 = vector.shape_cast %27 : vector<1x16x1xf32> to vector<16x1xf32>
    %29 = vector.broadcast %28 : vector<16x1xf32> to vector<16x16xf32>
    %30 = arith.addf %26, %29 : vector<16x16xf32>
    %cst_26 = arith.constant dense<0.000000e+00> : vector<16xf32>
    %31 = vector.multi_reduction <add>, %30, %cst_26 [1] : vector<16x16xf32> to vector<16xf32>
    %32 = vector.shape_cast %31 : vector<16xf32> to vector<16x1xf32>
    %cst_27 = arith.constant 1.600000e+01 : f32
    %33 = vector.broadcast %cst_27 : f32 to vector<16x1xf32>
    %34 = arith.divf %32, %33 : vector<16x1xf32>
    %35 = vector.broadcast %34 : vector<16x1xf32> to vector<16x16xf32>
    %36 = arith.subf %30, %35 : vector<16x16xf32>
    %37 = arith.mulf %36, %36 : vector<16x16xf32>
    %cst_28 = arith.constant dense<0.000000e+00> : vector<16xf32>
    %38 = vector.multi_reduction <add>, %37, %cst_28 [1] : vector<16x16xf32> to vector<16xf32>
    %39 = vector.shape_cast %38 : vector<16xf32> to vector<16x1xf32>
    %cst_29 = arith.constant 1.600000e+01 : f32
    %40 = vector.broadcast %cst_29 : f32 to vector<16x1xf32>
    %41 = arith.divf %39, %40 : vector<16x1xf32>
    %cst_30 = arith.constant 9.99999974E-6 : f32
    %42 = vector.broadcast %cst_30 : f32 to vector<16x1xf32>
    %43 = arith.addf %41, %42 : vector<16x1xf32>
    %44 = math.rsqrt %43 : vector<16x1xf32>
    %c0_31 = arith.constant 0 : index
    %c0_32 = arith.constant 0 : index
    %c1_33 = arith.constant 1 : index
    %45 = vector.load %arg5[%c0_31, %c0_32, %c1_33] : memref<3x64x3xf32, #tpu.memory_space<vmem>>, vector<1x16x1xf32>
    %46 = vector.shape_cast %45 : vector<1x16x1xf32> to vector<16x1xf32>
    %47 = arith.mulf %46, %44 : vector<16x1xf32>
    %c0_34 = arith.constant 0 : index
    %c0_35 = arith.constant 0 : index
    %c2_36 = arith.constant 2 : index
    %48 = vector.load %arg5[%c0_34, %c0_35, %c2_36] : memref<3x64x3xf32, #tpu.memory_space<vmem>>, vector<1x16x1xf32>
    %49 = vector.shape_cast %48 : vector<1x16x1xf32> to vector<16x1xf32>
    %50 = arith.mulf %34, %47 : vector<16x1xf32>
    %51 = arith.subf %49, %50 : vector<16x1xf32>
    %52 = vector.broadcast %47 : vector<16x1xf32> to vector<16x16xf32>
    %53 = arith.mulf %30, %52 : vector<16x16xf32>
    %54 = vector.broadcast %51 : vector<16x1xf32> to vector<16x16xf32>
    %55 = arith.addf %53, %54 : vector<16x16xf32>
    %cst_37 = arith.constant 0.000000e+00 : f32
    %56 = vector.broadcast %cst_37 : f32 to vector<16x16xf32>
    %57 = arith.maximumf %55, %56 : vector<16x16xf32>
    %58 = arith.truncf %57 : vector<16x16xf32> to vector<16x16xbf16>
    %c1_38 = arith.constant 1 : index
    %c0_39 = arith.constant 0 : index
    %c0_40 = arith.constant 0 : index
    %c0_41 = arith.constant 0 : index
    %59 = vector.load %arg3[%c1_38, %c0_39, %c0_40, %c0_41] : memref<3x3x32x16xbf16, #tpu.memory_space<vmem>>, vector<1x1x16x8xbf16>
    %60 = vector.shape_cast %59 : vector<1x1x16x8xbf16> to vector<16x8xbf16>
    %cst_42 = arith.constant dense<0.000000e+00> : vector<16x8xf32>
    %61 = tpu.matmul %58, %60, %cst_42 {dimension_numbers = #tpu.dot_dimension_numbers<[1], [0], [0], [1], [0, 0, 1, 1], [], []>} : vector<16x16xbf16>, vector<16x8xbf16>, vector<16x8xf32> -> vector<16x8xf32>
    %c1_43 = arith.constant 1 : index
    %c1_44 = arith.constant 1 : index
    %c0_45 = arith.constant 0 : index
    %c0_46 = arith.constant 0 : index
    %62 = vector.load %arg3[%c1_43, %c1_44, %c0_45, %c0_46] : memref<3x3x32x16xbf16, #tpu.memory_space<vmem>>, vector<1x1x16x8xbf16>
    %63 = vector.shape_cast %62 : vector<1x1x16x8xbf16> to vector<16x8xbf16>
    %cst_47 = arith.constant dense<0.000000e+00> : vector<16x8xf32>
    %64 = tpu.matmul %58, %63, %cst_47 {dimension_numbers = #tpu.dot_dimension_numbers<[1], [0], [0], [1], [0, 0, 1, 1], [], []>} : vector<16x16xbf16>, vector<16x8xbf16>, vector<16x8xf32> -> vector<16x8xf32>
    %c1_48 = arith.constant 1 : index
    %c2_49 = arith.constant 2 : index
    %c0_50 = arith.constant 0 : index
    %c0_51 = arith.constant 0 : index
    %65 = vector.load %arg3[%c1_48, %c2_49, %c0_50, %c0_51] : memref<3x3x32x16xbf16, #tpu.memory_space<vmem>>, vector<1x1x16x8xbf16>
    %66 = vector.shape_cast %65 : vector<1x1x16x8xbf16> to vector<16x8xbf16>
    %cst_52 = arith.constant dense<0.000000e+00> : vector<16x8xf32>
    %67 = tpu.matmul %58, %66, %cst_52 {dimension_numbers = #tpu.dot_dimension_numbers<[1], [0], [0], [1], [0, 0, 1, 1], [], []>} : vector<16x16xbf16>, vector<16x8xbf16>, vector<16x8xf32> -> vector<16x8xf32>
    %68 = tpu.concatenate %61, %64, %67 in 0 : vector<16x8xf32>, vector<16x8xf32>, vector<16x8xf32> -> vector<48x8xf32>
    %69 = arith.truncf %68 : vector<48x8xf32> to vector<48x8xbf16>
    %c1_53 = arith.constant 1 : index
    %c0_54 = arith.constant 0 : index
    %c0_55 = arith.constant 0 : index
    %70 = vector.load %arg4[%c1_53, %c0_54, %c0_55] : memref<3x64x96xbf16, #tpu.memory_space<vmem>>, vector<1x32x48xbf16>
    %71 = vector.shape_cast %70 : vector<1x32x48xbf16> to vector<32x48xbf16>
    %cst_56 = arith.constant dense<0.000000e+00> : vector<32x8xf32>
    %72 = tpu.matmul %71, %69, %cst_56 {dimension_numbers = #tpu.dot_dimension_numbers<[1], [0], [0], [1], [0, 0, 1, 1], [], []>} : vector<32x48xbf16>, vector<48x8xbf16>, vector<32x8xf32> -> vector<32x8xf32>
    %c1_57 = arith.constant 1 : index
    %c0_58 = arith.constant 0 : index
    %c0_59 = arith.constant 0 : index
    %73 = vector.load %arg5[%c1_57, %c0_58, %c0_59] : memref<3x64x3xf32, #tpu.memory_space<vmem>>, vector<1x32x1xf32>
    %74 = vector.shape_cast %73 : vector<1x32x1xf32> to vector<32x1xf32>
    %75 = vector.broadcast %74 : vector<32x1xf32> to vector<32x8xf32>
    %76 = arith.addf %72, %75 : vector<32x8xf32>
    %cst_60 = arith.constant dense<0.000000e+00> : vector<32xf32>
    %77 = vector.multi_reduction <add>, %76, %cst_60 [1] : vector<32x8xf32> to vector<32xf32>
    %78 = vector.shape_cast %77 : vector<32xf32> to vector<32x1xf32>
    %cst_61 = arith.constant 8.000000e+00 : f32
    %79 = vector.broadcast %cst_61 : f32 to vector<32x1xf32>
    %80 = arith.divf %78, %79 : vector<32x1xf32>
    %81 = vector.broadcast %80 : vector<32x1xf32> to vector<32x8xf32>
    %82 = arith.subf %76, %81 : vector<32x8xf32>
    %83 = arith.mulf %82, %82 : vector<32x8xf32>
    %cst_62 = arith.constant dense<0.000000e+00> : vector<32xf32>
    %84 = vector.multi_reduction <add>, %83, %cst_62 [1] : vector<32x8xf32> to vector<32xf32>
    %85 = vector.shape_cast %84 : vector<32xf32> to vector<32x1xf32>
    %cst_63 = arith.constant 8.000000e+00 : f32
    %86 = vector.broadcast %cst_63 : f32 to vector<32x1xf32>
    %87 = arith.divf %85, %86 : vector<32x1xf32>
    %cst_64 = arith.constant 9.99999974E-6 : f32
    %88 = vector.broadcast %cst_64 : f32 to vector<32x1xf32>
    %89 = arith.addf %87, %88 : vector<32x1xf32>
    %90 = math.rsqrt %89 : vector<32x1xf32>
    %c1_65 = arith.constant 1 : index
    %c0_66 = arith.constant 0 : index
    %c1_67 = arith.constant 1 : index
    %91 = vector.load %arg5[%c1_65, %c0_66, %c1_67] : memref<3x64x3xf32, #tpu.memory_space<vmem>>, vector<1x32x1xf32>
    %92 = vector.shape_cast %91 : vector<1x32x1xf32> to vector<32x1xf32>
    %93 = arith.mulf %92, %90 : vector<32x1xf32>
    %c1_68 = arith.constant 1 : index
    %c0_69 = arith.constant 0 : index
    %c2_70 = arith.constant 2 : index
    %94 = vector.load %arg5[%c1_68, %c0_69, %c2_70] : memref<3x64x3xf32, #tpu.memory_space<vmem>>, vector<1x32x1xf32>
    %95 = vector.shape_cast %94 : vector<1x32x1xf32> to vector<32x1xf32>
    %96 = arith.mulf %80, %93 : vector<32x1xf32>
    %97 = arith.subf %95, %96 : vector<32x1xf32>
    %98 = vector.broadcast %93 : vector<32x1xf32> to vector<32x8xf32>
    %99 = arith.mulf %76, %98 : vector<32x8xf32>
    %100 = vector.broadcast %97 : vector<32x1xf32> to vector<32x8xf32>
    %101 = arith.addf %99, %100 : vector<32x8xf32>
    %cst_71 = arith.constant 0.000000e+00 : f32
    %102 = vector.broadcast %cst_71 : f32 to vector<32x8xf32>
    %103 = arith.maximumf %101, %102 : vector<32x8xf32>
    %104 = arith.truncf %103 : vector<32x8xf32> to vector<32x8xbf16>
    %c2_72 = arith.constant 2 : index
    %c0_73 = arith.constant 0 : index
    %c0_74 = arith.constant 0 : index
    %c0_75 = arith.constant 0 : index
    %105 = vector.load %arg3[%c2_72, %c0_73, %c0_74, %c0_75] : memref<3x3x32x16xbf16, #tpu.memory_space<vmem>>, vector<1x1x8x4xbf16>
    %106 = vector.shape_cast %105 : vector<1x1x8x4xbf16> to vector<8x4xbf16>
    %cst_76 = arith.constant dense<0.000000e+00> : vector<32x4xf32>
    %107 = tpu.matmul %104, %106, %cst_76 {dimension_numbers = #tpu.dot_dimension_numbers<[1], [0], [0], [1], [0, 0, 1, 1], [], []>} : vector<32x8xbf16>, vector<8x4xbf16>, vector<32x4xf32> -> vector<32x4xf32>
    %c2_77 = arith.constant 2 : index
    %c1_78 = arith.constant 1 : index
    %c0_79 = arith.constant 0 : index
    %c0_80 = arith.constant 0 : index
    %108 = vector.load %arg3[%c2_77, %c1_78, %c0_79, %c0_80] : memref<3x3x32x16xbf16, #tpu.memory_space<vmem>>, vector<1x1x8x4xbf16>
    %109 = vector.shape_cast %108 : vector<1x1x8x4xbf16> to vector<8x4xbf16>
    %cst_81 = arith.constant dense<0.000000e+00> : vector<32x4xf32>
    %110 = tpu.matmul %104, %109, %cst_81 {dimension_numbers = #tpu.dot_dimension_numbers<[1], [0], [0], [1], [0, 0, 1, 1], [], []>} : vector<32x8xbf16>, vector<8x4xbf16>, vector<32x4xf32> -> vector<32x4xf32>
    %c2_82 = arith.constant 2 : index
    %c2_83 = arith.constant 2 : index
    %c0_84 = arith.constant 0 : index
    %c0_85 = arith.constant 0 : index
    %111 = vector.load %arg3[%c2_82, %c2_83, %c0_84, %c0_85] : memref<3x3x32x16xbf16, #tpu.memory_space<vmem>>, vector<1x1x8x4xbf16>
    %112 = vector.shape_cast %111 : vector<1x1x8x4xbf16> to vector<8x4xbf16>
    %cst_86 = arith.constant dense<0.000000e+00> : vector<32x4xf32>
    %113 = tpu.matmul %104, %112, %cst_86 {dimension_numbers = #tpu.dot_dimension_numbers<[1], [0], [0], [1], [0, 0, 1, 1], [], []>} : vector<32x8xbf16>, vector<8x4xbf16>, vector<32x4xf32> -> vector<32x4xf32>
    %114 = tpu.concatenate %107, %110, %113 in 0 : vector<32x4xf32>, vector<32x4xf32>, vector<32x4xf32> -> vector<96x4xf32>
    %115 = arith.truncf %114 : vector<96x4xf32> to vector<96x4xbf16>
    %c2_87 = arith.constant 2 : index
    %c0_88 = arith.constant 0 : index
    %c0_89 = arith.constant 0 : index
    %116 = vector.load %arg4[%c2_87, %c0_88, %c0_89] : memref<3x64x96xbf16, #tpu.memory_space<vmem>>, vector<1x64x96xbf16>
    %117 = vector.shape_cast %116 : vector<1x64x96xbf16> to vector<64x96xbf16>
    %cst_90 = arith.constant dense<0.000000e+00> : vector<64x4xf32>
    %118 = tpu.matmul %117, %115, %cst_90 {dimension_numbers = #tpu.dot_dimension_numbers<[1], [0], [0], [1], [0, 0, 1, 1], [], []>} : vector<64x96xbf16>, vector<96x4xbf16>, vector<64x4xf32> -> vector<64x4xf32>
    %c2_91 = arith.constant 2 : index
    %c0_92 = arith.constant 0 : index
    %c0_93 = arith.constant 0 : index
    %119 = vector.load %arg5[%c2_91, %c0_92, %c0_93] : memref<3x64x3xf32, #tpu.memory_space<vmem>>, vector<1x64x1xf32>
    %120 = vector.shape_cast %119 : vector<1x64x1xf32> to vector<64x1xf32>
    %121 = vector.broadcast %120 : vector<64x1xf32> to vector<64x4xf32>
    %122 = arith.addf %118, %121 : vector<64x4xf32>
    %cst_94 = arith.constant dense<0.000000e+00> : vector<64xf32>
    %123 = vector.multi_reduction <add>, %122, %cst_94 [1] : vector<64x4xf32> to vector<64xf32>
    %124 = vector.shape_cast %123 : vector<64xf32> to vector<64x1xf32>
    %cst_95 = arith.constant 4.000000e+00 : f32
    %125 = vector.broadcast %cst_95 : f32 to vector<64x1xf32>
    %126 = arith.divf %124, %125 : vector<64x1xf32>
    %127 = vector.broadcast %126 : vector<64x1xf32> to vector<64x4xf32>
    %128 = arith.subf %122, %127 : vector<64x4xf32>
    %129 = arith.mulf %128, %128 : vector<64x4xf32>
    %cst_96 = arith.constant dense<0.000000e+00> : vector<64xf32>
    %130 = vector.multi_reduction <add>, %129, %cst_96 [1] : vector<64x4xf32> to vector<64xf32>
    %131 = vector.shape_cast %130 : vector<64xf32> to vector<64x1xf32>
    %cst_97 = arith.constant 4.000000e+00 : f32
    %132 = vector.broadcast %cst_97 : f32 to vector<64x1xf32>
    %133 = arith.divf %131, %132 : vector<64x1xf32>
    %cst_98 = arith.constant 9.99999974E-6 : f32
    %134 = vector.broadcast %cst_98 : f32 to vector<64x1xf32>
    %135 = arith.addf %133, %134 : vector<64x1xf32>
    %136 = math.rsqrt %135 : vector<64x1xf32>
    %c2_99 = arith.constant 2 : index
    %c0_100 = arith.constant 0 : index
    %c1_101 = arith.constant 1 : index
    %137 = vector.load %arg5[%c2_99, %c0_100, %c1_101] : memref<3x64x3xf32, #tpu.memory_space<vmem>>, vector<1x64x1xf32>
    %138 = vector.shape_cast %137 : vector<1x64x1xf32> to vector<64x1xf32>
    %139 = arith.mulf %138, %136 : vector<64x1xf32>
    %c2_102 = arith.constant 2 : index
    %c0_103 = arith.constant 0 : index
    %c2_104 = arith.constant 2 : index
    %140 = vector.load %arg5[%c2_102, %c0_103, %c2_104] : memref<3x64x3xf32, #tpu.memory_space<vmem>>, vector<1x64x1xf32>
    %141 = vector.shape_cast %140 : vector<1x64x1xf32> to vector<64x1xf32>
    %142 = arith.mulf %126, %139 : vector<64x1xf32>
    %143 = arith.subf %141, %142 : vector<64x1xf32>
    %144 = vector.broadcast %139 : vector<64x1xf32> to vector<64x4xf32>
    %145 = arith.mulf %122, %144 : vector<64x4xf32>
    %146 = vector.broadcast %143 : vector<64x1xf32> to vector<64x4xf32>
    %147 = arith.addf %145, %146 : vector<64x4xf32>
    %cst_105 = arith.constant 0.000000e+00 : f32
    %148 = vector.broadcast %cst_105 : f32 to vector<64x4xf32>
    %149 = arith.maximumf %147, %148 : vector<64x4xf32>
    %150 = arith.truncf %149 : vector<64x4xf32> to vector<64x4xbf16>
    %c0_106 = arith.constant 0 : index
    %c0_107 = arith.constant 0 : index
    %c0_108 = arith.constant 0 : index
    %151 = vector.load %arg7[%c0_106, %c0_107, %c0_108] : memref<2x4x2xbf16, #tpu.memory_space<vmem>>, vector<1x4x2xbf16>
    %152 = vector.shape_cast %151 : vector<1x4x2xbf16> to vector<4x2xbf16>
    %cst_109 = arith.constant dense<0.000000e+00> : vector<64x2xf32>
    %153 = tpu.matmul %150, %152, %cst_109 {dimension_numbers = #tpu.dot_dimension_numbers<[1], [0], [0], [1], [0, 0, 1, 1], [], []>} : vector<64x4xbf16>, vector<4x2xbf16>, vector<64x2xf32> -> vector<64x2xf32>
    %c1_110 = arith.constant 1 : index
    %c0_111 = arith.constant 0 : index
    %c0_112 = arith.constant 0 : index
    %154 = vector.load %arg7[%c1_110, %c0_111, %c0_112] : memref<2x4x2xbf16, #tpu.memory_space<vmem>>, vector<1x4x2xbf16>
    %155 = vector.shape_cast %154 : vector<1x4x2xbf16> to vector<4x2xbf16>
    %cst_113 = arith.constant dense<0.000000e+00> : vector<64x2xf32>
    %156 = tpu.matmul %150, %155, %cst_113 {dimension_numbers = #tpu.dot_dimension_numbers<[1], [0], [0], [1], [0, 0, 1, 1], [], []>} : vector<64x4xbf16>, vector<4x2xbf16>, vector<64x2xf32> -> vector<64x2xf32>
    %157 = tpu.concatenate %153, %156 in 0 : vector<64x2xf32>, vector<64x2xf32> -> vector<128x2xf32>
    %158 = arith.truncf %157 : vector<128x2xf32> to vector<128x2xbf16>
    %c0_114 = arith.constant 0 : index
    %c0_115 = arith.constant 0 : index
    %159 = vector.load %arg6[%c0_114, %c0_115] : memref<2x128xbf16, #tpu.memory_space<vmem>>, vector<2x128xbf16>
    %cst_116 = arith.constant dense<0.000000e+00> : vector<2x2xf32>
    %160 = tpu.matmul %159, %158, %cst_116 {dimension_numbers = #tpu.dot_dimension_numbers<[1], [0], [0], [1], [0, 0, 1, 1], [], []>} : vector<2x128xbf16>, vector<128x2xbf16>, vector<2x2xf32> -> vector<2x2xf32>
    %c0_117 = arith.constant 0 : index
    %c0_118 = arith.constant 0 : index
    %161 = vector.load %arg8[%c0_117, %c0_118] : memref<2x1xf32, #tpu.memory_space<vmem>>, vector<2x1xf32>
    %162 = vector.broadcast %161 : vector<2x1xf32> to vector<2x2xf32>
    %163 = arith.addf %160, %162 : vector<2x2xf32>
    %c0_119 = arith.constant 0 : index
    %c0_120 = arith.constant 0 : index
    %164 = vector.load %arg9[%c0_119, %c0_120] : memref<2x2xf32, #tpu.memory_space<vmem>>, vector<2x2xf32>
    tpu.vector_store %arg9[%c0_119, %c0_120], %163 {strides = array<i32>} : memref<2x2xf32, #tpu.memory_space<vmem>>, vector<2x2xf32>,
    return
  }
}

</mosaic_0001>

<bundles_post_ra>
// kernel: tpu_custom_call.1
= control target key start
LH: loop header
LB: loop body
LE: loop exit
PB: predicated region body
PF: predicated region fallthrough
CT: control target
= control target key end

     0   :  { %v2092_v1 = vmov 0.0   ;;  %vm2093_vm0 = vmmov 0   ;;  %vm49_vm1 = vcmask 130048   ;;  %s2588_s0 = inlined_call_operand.vmem [shape: bf16[16,16], index: 0, kind: input, shape index: {}]   ;;  %s2589_s1 = inlined_call_operand.vmem [shape: bf16[16,16], index: 1, kind: input, shape index: {}]   ;;  %s2590_s2 = inlined_call_operand.vmem [shape: bf16[16,16], index: 2, kind: input, shape index: {}]   ;;  %s2591_s3 = inlined_call_operand.vmem [shape: bf16[3,3,32,16], index: 3, kind: input, shape index: {}]   ;;  %s2592_s4 = inlined_call_operand.vmem [shape: bf16[3,64,96], index: 4, kind: input, shape index: {}]   ;;  %s2593_s5 = inlined_call_operand.vmem [shape: f32[3,64,3], index: 5, kind: input, shape index: {}]   ;;  %s2594_s6 = inlined_call_operand.vmem [shape: bf16[2,128], index: 6, kind: input, shape index: {}]   ;;  %s2595_s7 = inlined_call_operand.vmem [shape: bf16[2,4,2], index: 7, kind: input, shape index: {}]   ;;  %s2596_s8 = inlined_call_operand.vmem [shape: f32[2,1], index: 8, kind: input, shape index: {}]   ;;  %s2597_s9 = inlined_call_operand.hbm [shape: f32[2,2], index: 9, kind: output, shape index: {}]  }
   0x1   :  { %v2017_v0 = vld [vmem:[%s2589_s1] sm:$0xff]   ;;  %1833 = vmatprep.subr.bf16.mxu0 %v2092_v1  ;;  %1839 = vmatprep.subr.bf16.mxu1 %v2092_v1 }
   0x2   :  { %v2018_v2 = vld [vmem:[%s2590_s2] sm:$0xff]   ;;  %1834 = vmatpush3.bf16.msra.mxu0 %v2017_v0  ;;  %1835 = vmatprep.mubr.msk.bf16.mxu0 %vm2093_vm0, %v2092_v1 }
   0x3   :  { %v2019_v3 = vld [vmem:[%s2588_s0] sm:$0xff]   ;;  %1840 = vmatpush3.bf16.msra.mxu1 %v2018_v2  ;;  %1841 = vmatprep.mubr.msk.bf16.mxu1 %vm2093_vm0, %v2092_v1 }
   0x4   :  { %1845 = vmatprep.subr.bf16.mxu0 %v2092_v1  ;;  %1869 = vmatprep.subr.bf16.mxu1 %v2092_v1 }
   0x5   :  { %1836 = vmatmul.mubr.msk.bf16.vlgmr.msra.gmra.mrb[0].mxu0 %vm49_vm1, %v2019_v3 }
   0x6   :  { %1842 = vmatmul.mubr.msk.bf16.vlgmr.msra.gmra.mrb[0].mxu1 %vm49_vm1, %v2019_v3  ;;  %1849 = vmatprep.mubr.msk.bf16.mxu0 %vm2093_vm0, %v2092_v1 }
   0x7   :  { %1873 = vmatprep.mubr.msk.bf16.mxu1 %vm2093_vm0, %v2092_v1 }
   0x8   :  { %14 = vsyncpa [#allocation3], 0  ;;  %v2020_v4 = vld [vmem:[%s2591_s3] sm:$0xff]   ;;  %v2021_v19 = vld [vmem:[%s2591_s3 + $0x8] sm:$0xff]   ;;  %s2094_s16 = smov 16   ;;  %vm185_vm6 = vcmask 261120  }
   0x9   :  { %1846 = vmatpush3.bf16.msra.mxu0 %v2020_v4  ;;  %v2022_v32 = vld [vmem:[%s2591_s3 + $0x10] sm:$0xff]   ;;  %v2023_v34 = vld [vmem:[%s2591_s3 + $0x18] sm:$0xff]   ;;  %v2024_v35 = vld [vmem:[%s2591_s3 + $0x20] sm:$0xff]   ;;  %v2095_v39 = vmov 0   ;;  %vm368_vm7 = vcmask 1043456   ;;  %vm364_vm8 = vcmask 195584  }
   0xa   :  { %1847 = vmatprep.subr.bf16.mxu0 %v2092_v1  ;;  %v2025_v36 = vld [vmem:[%s2591_s3 + $0x28] sm:$0xff]   ;;  %v2210_v37 = vld [vmem:[%s2593_s5] sm:$0xff]  ;;  %1996 = vset.pattern.permute.xlu0 %v2095_v39  ;;  %s2098_s10 = smov 1   ;;  %vm675_vm9 = vcmask 392192   ;;  %vm731_vm10 = vcmask 64512   ;;  %vm1115_vm11 = vcmask 785408  }
   0xb   :  { %v2215_v38 = vld [vmem:[%s2593_s5 + $0x8] sm:$0xff]  ;;  %1997 = vset.pattern.permute.xlu1 %v2095_v39  ;;  %v2026_v55 = vld [vmem:[%s2592_s4] sm:$0xff]   ;;  %vm1193_vm12 = vcmask 31744   ;;  %vm1468_vm13 = vcmask 1041408   ;;  %s2099_s14 = smov [#allocation2]   ;;  %vm1662_vm14 = vcmask 9216  }
   0xc   :  { %356 = vperm.xlu1 %1997, %v2215_v38   ;;  %s1670_s0 = sshll.u32 %s2099_s14, 4  ;;  %s1671_s0 = int_to_ptr.vmem [resolvable:$true] %s1670_s0 }
   0xd   :  { %1848 = vmatpush3.bf16.msra.mxu0 %v2021_v19  ;;  %s2068_s1 = scalar_lea.vmem %s1671_s0, 32  ;;  %p2073_p1 = scmp.lt.s32.totalorder %s1671_s0, %s1671_s0 }
   0xe   :  { %1853 = vmatprep.subr.bf16.mxu0 %v2092_v1  ;;  %p2069_p0 = scmp.ne.s32.totalorder %s1671_s0, %s2068_s1  ;;  %p2074_p2 = scmp.lt.s32.totalorder %s2068_s1, %s2068_s1 }
  0x10   :  { %p2075_p3 = por %p2074_p2, %p2073_p1 }
  0x12   :  { %p2076_p4 = pnand %p2075_p3, %p2069_p0 }
  0x8b   :  { %v357_v58 = vpop.permute.xlu1 %356 }
  0xd8   :  { %v87_v5 = vpop.f32.mrb[0].mxu0 }
  0xd9   :  { %v143_v6 = vmul.f32 %v87_v5, %v87_v5  ;;  %v136_v7 = vpop.f32.mrb[0].mxu1  ;;  %v1837_v8 = vpop.f32.mrb[1].mxu0 }
  0xda   :  { %v145_v9 = vmul.f32 %v136_v7, %v136_v7  ;;  %v1843_v10 = vpop.f32.mrb[1].mxu1  ;;  %v90_v11 = vpop.f32.mrb[2].mxu0 }
  0xdb   :  { %v144_v12 = vmul.f32 %v90_v11, %v90_v11  ;;  %v139_v13 = vpop.f32.mrb[2].mxu1  ;;  %v1838_v14 = vpop.f32.mrb[3].mxu0 }
  0xdc   :  { %v147_v15 = vadd.f32 %v145_v9, %v143_v6  ;;  %v146_v16 = vmul.f32 %v139_v13, %v139_v13  ;;  %v1844_v17 = vpop.f32.mrb[3].mxu1  ;;  %v2096_v13 = vmov 1  }
  0xdd   :  { %1998 = vset.pattern.permute.xlu1 %v2096_v13 }
  0xde   :  { %v148_v18 = vadd.f32 %v146_v16, %v144_v12  ;;  %vm151_vm4 = vcmp.eq.f32.partialorder %v147_v15, inf  ;;  %v154_v28 = vand.u32 2147483648, %v147_v15  ;;  %vm153_vm5 = vcmp.eq.f32.partialorder %v147_v15, 0.0 }
  0xe0   :  { %2036 = vrsqrt.f32 %v148_v18  ;;  %vm158_vm2 = vcmp.eq.f32.partialorder %v148_v18, inf  ;;  %v161_v22 = vand.u32 2147483648, %v148_v18  ;;  %vm160_vm3 = vcmp.eq.f32.partialorder %v148_v18, 0.0 }
  0xe1   :  { %2038 = vrsqrt.f32 %v147_v15 }
  0xea   :  { %v2037_v20 = vpop.eup %2036 }
  0xeb   :  { %v157_v21 = vmul.f32 %v2037_v20, %v148_v18  ;;  %v2039_v25 = vpop.eup %2038  ;;  %v2097_v20 = vmov 2  }
  0xec   :  { %v150_v26 = vmul.f32 %v2039_v25, %v147_v15 }
  0xed   :  { %v159_v23 = vsel %vm158_vm2, %v148_v18, %v157_v21 }
  0xee   :  { %v162_v24 = vsel %vm160_vm3, %v161_v22, %v159_v23  ;;  %v152_v27 = vsel %vm151_vm4, %v147_v15, %v150_v26 }
  0xef   :  { %164 = vrot.lane.b32.xlu0 %v162_v24, %s2094_s16  ;;  %v155_v29 = vsel %vm153_vm5, %v154_v28, %v152_v27 }
  0xf3   :  { %351 = vperm.xlu0 %1996, %v2210_v37  }
  0xf7   :  { %1999 = vset.pattern.permute.xlu0 %v2097_v20 }
 0x161   :  { %v165_v30 = vpop.permute.xlu0 %164 }
 0x162   :  { %v167_v31 = vsel %vm49_vm1, %v155_v29, %v165_v30 }
 0x163   :  { %v168_v33 = vpack.c.bf16 %v167_v31, %v167_v31  ;;  %v2027_v31 = vld [vmem:[%s2591_s3 + $0x30] sm:$0xff]  }
 0x165   :  { %1850 = vmatmul.mubr.msk.bf16.vlgmr.msra.gmra.mrb[4].mxu0 %vm185_vm6, %v168_v33 }
 0x166   :  { %1854 = vmatpush3.bf16.msra.mxu0 %v2022_v32  ;;  %1857 = vmatprep.mubr.msk.bf16.mxu0 %vm2093_vm0, %v2092_v1  ;;  %v2028_v32 = vld [vmem:[%s2591_s3 + $0x40] sm:$0xff]  }
 0x167   :  { %1855 = vmatprep.subr.bf16.mxu0 %v2092_v1 }
 0x16a   :  { %1856 = vmatpush3.bf16.msra.mxu0 %v2023_v34 }
 0x16b   :  { %1861 = vmatprep.subr.bf16.mxu0 %v2092_v1 }
 0x16d   :  { %1858 = vmatmul.mubr.msk.bf16.vlgmr.msra.gmra.mrb[8].mxu0 %vm185_vm6, %v168_v33 }
 0x16e   :  { %1862 = vmatpush3.bf16.msra.mxu0 %v2024_v35  ;;  %1865 = vmatprep.mubr.msk.bf16.mxu0 %vm2093_vm0, %v2092_v1 }
 0x16f   :  { %1863 = vmatprep.subr.bf16.mxu0 %v2092_v1 }
 0x172   :  { %1864 = vmatpush3.bf16.msra.mxu0 %v2025_v36  ;;  %v352_v56 = vpop.permute.xlu0 %351 }
 0x173   :  { %1877 = vmatprep.subr.bf16.mxu0 %v2092_v1 }
 0x175   :  { %1866 = vmatmul.mubr.msk.bf16.vlgmr.msra.gmra.mrb[12].mxu0 %vm185_vm6, %v168_v33 }
 0x176   :  { %1879 = vmatprep.mubr.msk.bf16.mxu0 %vm2093_vm0, %v2092_v1  ;;  %1878 = vmatpush3.bf16.msra.mxu0 %v2027_v31 }
 0x177   :  { %1889 = vmatprep.subr.bf16.mxu0 %v2092_v1 }
 0x238   :  { %v223_v40 = vpop.f32.mrb[4].mxu0 }
 0x239   :  { %v1851_v41 = vpop.f32.mrb[5].mxu0 }
 0x23a   :  { %v226_v42 = vpop.f32.mrb[6].mxu0 }
 0x23b   :  { %v1852_v43 = vpop.f32.mrb[7].mxu0 }
 0x240   :  { %v280_v44 = vpop.f32.mrb[8].mxu0 }
 0x241   :  { %v343_v45 = vpack.c.bf16 %v280_v44, %v223_v40  ;;  %v1859_v46 = vpop.f32.mrb[9].mxu0  ;;  %v2029_v44 = vld [vmem:[%s2591_s3 + $0x50] sm:$0xff]  }
 0x242   :  { %v283_v47 = vpop.f32.mrb[10].mxu0  ;;  %v2030_v46 = vld [vmem:[%s2592_s4 + $0x20] sm:$0xff]  }
 0x243   :  { %v1860_v48 = vpop.f32.mrb[11].mxu0  ;;  %1870 = vmatpush3.bf16.msra.mxu1 %v343_v45  ;;  %v2266_v47 = vld [vmem:[%s2593_s5 + $0x40] sm:$0xff] }
 0x244   :  { %1871 = vmatprep.subr.bf16.mxu1 %v2092_v1  ;;  %v2272_v48 = vld [vmem:[%s2593_s5 + $0x48] sm:$0xff] }
 0x248   :  { %v337_v49 = vpop.f32.mrb[12].mxu0 }
 0x249   :  { %v344_v50 = vpack.c.bf16 %v337_v49, %v337_v49  ;;  %v1867_v51 = vpop.f32.mrb[13].mxu0  ;;  %v2277_v49 = vld [vmem:[%s2593_s5 + $0x50] sm:$0xff] }
 0x24a   :  { %v340_v52 = vpop.f32.mrb[14].mxu0 }
 0x24b   :  { %v370_v53 = vsel %vm368_vm7, %v344_v50, 0  ;;  %v1868_v54 = vpop.f32.mrb[15].mxu0  ;;  %v2284_v50 = vld [vmem:[%s2593_s5 + $0x58] sm:$0xff] }
 0x24c   :  { %1872 = vmatpush3.bf16.msra.mxu1 %v370_v53 }
 0x24d   :  { %1883 = vmatprep.subr.bf16.mxu1 %v2092_v1 }
 0x24f   :  { %1874 = vmatmul.mubr.msk.bf16.vlgmr.msra.gmra.mrb[4].mxu1 %vm364_vm8, %v2026_v55 }
 0x250   :  { %1885 = vmatprep.mubr.msk.bf16.mxu1 %vm2093_vm0, %v2092_v1  ;;  %1884 = vmatpush3.bf16.msra.mxu1 %v2028_v32 }
 0x322   :  { %v406_v57 = vpop.f32.mrb[4].mxu1 }
 0x323   :  { %v407_v59 = vadd.f32 %v406_v57, %v352_v56  ;;  %v1875_v60 = vpop.f32.mrb[5].mxu1 }
 0x324   :  { %v409_v61 = vpop.f32.mrb[6].mxu1 }
 0x325   :  { %v410_v62 = vadd.f32 %v409_v61, %v357_v58  ;;  %v1876_v63 = vpop.f32.mrb[7].mxu1  ;;  %v413_v0 = vsel %vm49_vm1, %v407_v59, 0.0 }
 0x326   :  { %414 = vadd.xlane.f32.xlu1 %v413_v0 }
 0x327   :  { %v416_v2 = vsel %vm49_vm1, %v410_v62, 0.0 }
 0x328   :  { %417 = vadd.xlane.f32.xlu0 %v416_v2 }
 0x3b3   :  { %v415_v3 = vpop.xlane.xlu1 %414 }
 0x3b4   :  { %v420_v4 = vmul.f32 0.0625, %v415_v3  ;;  %v2031_v3 = vld [vmem:[%s2592_s4 + $0x28] sm:$0xff]  }
 0x3b5   :  { %v418_v5 = vpop.xlane.xlu0 %417 }
 0x3b6   :  { %v422_v6 = vsub.f32 %v407_v59, %v420_v4  ;;  %v421_v7 = vmul.f32 0.0625, %v418_v5 }
 0x3b8   :  { %v423_v8 = vsub.f32 %v410_v62, %v421_v7  ;;  %v424_v9 = vmul.f32 %v422_v6, %v422_v6 }
 0x3ba   :  { %v426_v10 = vsel %vm49_vm1, %v424_v9, 0.0  ;;  %v425_v11 = vmul.f32 %v423_v8, %v423_v8 }
 0x3bb   :  { %427 = vadd.xlane.f32.xlu1 %v426_v10 }
 0x3bc   :  { %v429_v12 = vsel %vm49_vm1, %v425_v11, 0.0 }
 0x3bd   :  { %430 = vadd.xlane.f32.xlu0 %v429_v12 }
 0x448   :  { %v428_v14 = vpop.xlane.xlu1 %427 }
 0x449   :  { %v432_v15 = vmul.f32 0.0625, %v428_v14 }
 0x44a   :  { %v431_v16 = vpop.xlane.xlu0 %430 }
 0x44b   :  { %v434_v17 = vadd.f32 1e-05, %v432_v15  ;;  %v433_v18 = vmul.f32 0.0625, %v431_v16 }
 0x44d   :  { %2040 = vrsqrt.f32 %v434_v17  ;;  %v435_v19 = vadd.f32 1e-05, %v433_v18 }
 0x44f   :  { %2042 = vrsqrt.f32 %v435_v19 }
 0x457   :  { %v2041_v21 = vpop.eup %2040 }
 0x458   :  { %v438_v22 = vmul.f32 %v2041_v21, %v2210_v37 }
 0x459   :  { %v2043_v23 = vpop.eup %2042 }
 0x45a   :  { %v440_v24 = vmul.f32 %v438_v22, %v420_v4  ;;  %v439_v25 = vmul.f32 %v2043_v23, %v2215_v38 }
 0x45c   :  { %444 = vrot.lane.b32.xlu1 %v440_v24, %s2098_s10  ;;  %v441_v26 = vmul.f32 %v439_v25, %v421_v7 }
 0x45e   :  { %446 = vrot.lane.b32.xlu0 %v441_v26, %s2098_s10 }
 0x460   :  { %454 = vperm.xlu1 %1998, %v438_v22  }
 0x464   :  { %459 = vperm.xlu1 %1998, %v439_v25  }
 0x468   :  { %2000 = vset.pattern.permute.xlu1 %v2097_v20 }
 0x4ce   :  { %v445_v27 = vpop.permute.xlu1 %444 }
 0x4cf   :  { %v450_v28 = vsub.f32 %v2210_v37, %v445_v27 }
 0x4d0   :  { %v447_v29 = vpop.permute.xlu0 %446 }
 0x4d1   :  { %v451_v30 = vsub.f32 %v2215_v38, %v447_v29  ;;  %466 = vperm.xlu0 %1999, %v450_v28  }
 0x4d3   :  { %471 = vperm.xlu1 %2000, %v451_v30  }
 0x4d5   :  { %2002 = vset.pattern.permute.xlu0 %v2095_v39 }
 0x4d6   :  { %652 = vperm.xlu0 %2002, %v2272_v48  }
 0x4d7   :  { %2001 = vset.pattern.permute.xlu1 %v2095_v39 }
 0x4d8   :  { %647 = vperm.xlu1 %2001, %v2266_v47  }
 0x4da   :  { %2003 = vset.pattern.permute.xlu0 %v2096_v13 }
 0x4dc   :  { %657 = vperm.xlu1 %2001, %v2277_v49  }
 0x4df   :  { %v455_v33 = vpop.permute.xlu1 %454 }
 0x4e0   :  { %v462_v35 = vmul.f32 %v455_v33, %v407_v59  ;;  %662 = vperm.xlu1 %2001, %v2284_v50  }
 0x4e3   :  { %v460_v34 = vpop.permute.xlu1 %459 }
 0x4e4   :  { %v463_v37 = vmul.f32 %v460_v34, %v410_v62  ;;  %2004 = vset.pattern.permute.xlu1 %v2096_v13 }
 0x550   :  { %v467_v36 = vpop.permute.xlu0 %466 }
 0x551   :  { %v474_v38 = vadd.f32 %v467_v36, %v462_v35 }
 0x552   :  { %v472_v40 = vpop.permute.xlu1 %471 }
 0x553   :  { %v475_v41 = vadd.f32 %v472_v40, %v463_v37  ;;  %v476_v42 = vmax.f32 %v474_v38, 0.0 }
 0x555   :  { %v477_v43 = vmax.f32 %v475_v41, 0.0  ;;  %v653_v8 = vpop.permute.xlu0 %652 }
 0x557   :  { %v478_v45 = vpack.c.bf16 %v477_v43, %v476_v42  ;;  %v648_v4 = vpop.permute.xlu1 %647 }
 0x559   :  { %1880 = vmatmul.mubr.msk.bf16.vlgmr.msra.gmra.mrb[16].mxu0 %vm49_vm1, %v478_v45  ;;  %1886 = vmatmul.mubr.msk.bf16.vlgmr.msra.gmra.mrb[8].mxu1 %vm49_vm1, %v478_v45 }
 0x55a   :  { %1890 = vmatpush3.bf16.msra.mxu0 %v2029_v44  ;;  %1891 = vmatprep.mubr.msk.bf16.mxu0 %vm2093_vm0, %v2092_v1 }
 0x55b   :  { %1901 = vmatprep.mubr.msk.bf16.mxu1 %vm675_vm9, %v2030_v46  ;;  %v658_v5 = vpop.permute.xlu1 %657 }
 0x55f   :  { %v663_v16 = vpop.permute.xlu1 %662 }
 0x561   :  { %1892 = vmatmul.mubr.msk.bf16.vlgmr.msra.gmra.mrb[20].mxu0 %vm49_vm1, %v478_v45 }
 0x62c   :  { %v525_v51 = vpop.f32.mrb[16].mxu0  ;;  %v575_v52 = vpop.f32.mrb[8].mxu1 }
 0x62d   :  { %v1881_v53 = vpop.f32.mrb[17].mxu0  ;;  %v1887_v54 = vpop.f32.mrb[9].mxu1 }
 0x62e   :  { %v528_v55 = vpop.f32.mrb[18].mxu0  ;;  %v578_v56 = vpop.f32.mrb[10].mxu1 }
 0x62f   :  { %v632_v57 = vpack.c.bf16 %v528_v55, %v525_v51  ;;  %v633_v58 = vpack.c.bf16 %v578_v56, %v575_v52  ;;  %v1882_v59 = vpop.f32.mrb[19].mxu0  ;;  %v1888_v60 = vpop.f32.mrb[11].mxu1 }
 0x631   :  { %1895 = vmatprep.subr.bf16.mxu1 %v632_v57 }
 0x632   :  { %1896 = vmatpush3.bf16.msra.mxu1 %v632_v57 }
 0x633   :  { %1897 = vmatprep.subr.bf16.mxu1 %v633_v58 }
 0x634   :  { %v625_v61 = vpop.f32.mrb[20].mxu0 }
 0x635   :  { %v1893_v62 = vpop.f32.mrb[21].mxu0 }
 0x636   :  { %v628_v63 = vpop.f32.mrb[22].mxu0  ;;  %1898 = vmatpush3.bf16.msra.mxu1 %v633_v58 }
 0x637   :  { %v634_v0 = vpack.c.bf16 %v628_v63, %v625_v61  ;;  %v1894_v2 = vpop.f32.mrb[23].mxu0 }
 0x639   :  { %1899 = vmatprep.subr.bf16.mxu1 %v634_v0 }
 0x63a   :  { %1900 = vmatpush3.bf16.msra.mxu1 %v634_v0 }
 0x63d   :  { %1902 = vmatmul.mubr.msk.bf16.vlgmr.msra.gmra.mrb[12].mxu1 %vm675_vm9, %v2031_v3 }
 0x710   :  { %v1903_v6 = vpop.f32.mrb[12].mxu1 }
 0x711   :  { %v716_v7 = vpop.f32.mrb[13].mxu1  ;;  %v2295_v12 = vadd.f32 %v1903_v6, %v658_v5 }
 0x712   :  { %v2293_v9 = vadd.f32 %v716_v7, %v648_v4  ;;  %v1904_v10 = vpop.f32.mrb[14].mxu1 }
 0x713   :  { %v719_v11 = vpop.f32.mrb[15].mxu1  ;;  %v2303_v18 = vadd.f32 %v1904_v10, %v663_v16  ;;  %v738_v19 = vsel %vm731_vm10, %v2295_v12, 0.0 }
 0x714   :  { %v2297_v14 = vadd.f32 %v719_v11, %v653_v8  ;;  %v732_v15 = vsel %vm731_vm10, %v2293_v9, 0.0 }
 0x715   :  { %733 = vadd.xlane.f32.xlu0 %v732_v15  ;;  %v741_v21 = vsel %vm731_vm10, %v2303_v18, 0.0 }
 0x716   :  { %v735_v17 = vsel %vm731_vm10, %v2297_v14, 0.0 }
 0x717   :  { %736 = vadd.xlane.f32.xlu1 %v735_v17 }
 0x719   :  { %739 = vadd.xlane.f32.xlu0 %v738_v19 }
 0x71d   :  { %742 = vadd.xlane.f32.xlu0 %v741_v21 }
 0x7a2   :  { %v734_v22 = vpop.xlane.xlu0 %733 }
 0x7a3   :  { %v745_v23 = vmul.f32 0.125, %v734_v22  ;;  %v1726_v22 = vld [vmem:[%s2591_s3 + $0x60] sm:$0xf] }
 0x7a4   :  { %v737_v24 = vpop.xlane.xlu1 %736  ;;  %1983 = vmatprep.subr.msk.bf16.mxu0 %vm368_vm7, %v1726_v22 }
 0x7a5   :  { %v749_v25 = vsub.f32 %v2293_v9, %v745_v23  ;;  %v746_v26 = vmul.f32 0.125, %v737_v24 }
 0x7a6   :  { %v740_v27 = vpop.xlane.xlu0 %739 }
 0x7a7   :  { %v750_v28 = vsub.f32 %v2297_v14, %v746_v26  ;;  %v747_v29 = vmul.f32 0.125, %v740_v27  ;;  %v753_v30 = vmul.f32 %v749_v25, %v749_v25 }
 0x7a9   :  { %v751_v31 = vsub.f32 %v2295_v12, %v747_v29  ;;  %v757_v32 = vsel %vm731_vm10, %v753_v30, 0.0  ;;  %v754_v33 = vmul.f32 %v750_v28, %v750_v28 }
 0x7aa   :  { %758 = vadd.xlane.f32.xlu1 %v757_v32  ;;  %v743_v34 = vpop.xlane.xlu0 %742 }
 0x7ab   :  { %v748_v35 = vmul.f32 0.125, %v743_v34  ;;  %v760_v36 = vsel %vm731_vm10, %v754_v33, 0.0  ;;  %v755_v37 = vmul.f32 %v751_v31, %v751_v31 }
 0x7ac   :  { %761 = vadd.xlane.f32.xlu0 %v760_v36 }
 0x7ad   :  { %v752_v38 = vsub.f32 %v2303_v18, %v748_v35  ;;  %v763_v40 = vsel %vm731_vm10, %v755_v37, 0.0 }
 0x7ae   :  { %764 = vadd.xlane.f32.xlu1 %v763_v40 }
 0x7af   :  { %v756_v41 = vmul.f32 %v752_v38, %v752_v38 }
 0x7b1   :  { %v766_v42 = vsel %vm731_vm10, %v756_v41, 0.0 }
 0x7b2   :  { %767 = vadd.xlane.f32.xlu0 %v766_v42 }
 0x837   :  { %v759_v43 = vpop.xlane.xlu1 %758 }
 0x838   :  { %v769_v44 = vmul.f32 0.125, %v759_v43 }
 0x839   :  { %v762_v45 = vpop.xlane.xlu0 %761 }
 0x83a   :  { %v773_v46 = vadd.f32 1e-05, %v769_v44  ;;  %v770_v51 = vmul.f32 0.125, %v762_v45  ;;  %v2370_v45 = vld [vmem:[%s2593_s5 + $0x80] sm:$0xff] }
 0x83b   :  { %v765_v52 = vpop.xlane.xlu1 %764 }
 0x83c   :  { %2044 = vrsqrt.f32 %v773_v46  ;;  %v774_v53 = vadd.f32 1e-05, %v770_v51  ;;  %v771_v54 = vmul.f32 0.125, %v765_v52  ;;  %v2377_v46 = vld [vmem:[%s2593_s5 + $0x90] sm:$0xff]  ;;  %v2382_v51 = vld [vmem:[%s2593_s5 + $0x98] sm:$0xff]  ;;  %v2389_v52 = vld [vmem:[%s2593_s5 + $0xa0] sm:$0xff] }
 0x83e   :  { %2046 = vrsqrt.f32 %v774_v53  ;;  %v775_v55 = vadd.f32 1e-05, %v771_v54  ;;  %v2394_v53 = vld [vmem:[%s2593_s5 + $0xa8] sm:$0xff]  ;;  %v2401_v54 = vld [vmem:[%s2593_s5 + $0xb0] sm:$0xff] }
 0x83f   :  { %v768_v56 = vpop.xlane.xlu0 %767 }
 0x840   :  { %2048 = vrsqrt.f32 %v775_v55  ;;  %v772_v57 = vmul.f32 0.125, %v768_v56  ;;  %v2406_v55 = vld [vmem:[%s2593_s5 + $0xb8] sm:$0xff] }
 0x842   :  { %v776_v58 = vadd.f32 1e-05, %v772_v57 }
 0x844   :  { %2050 = vrsqrt.f32 %v776_v58 }
 0x846   :  { %v2045_v59 = vpop.eup %2044 }
 0x847   :  { %v781_v60 = vmul.f32 %v2045_v59, %v2266_v47 }
 0x848   :  { %v2047_v61 = vpop.eup %2046 }
 0x849   :  { %v785_v62 = vmul.f32 %v781_v60, %v745_v23  ;;  %v782_v63 = vmul.f32 %v2047_v61, %v2272_v48 }
 0x84a   :  { %v2049_v0 = vpop.eup %2048 }
 0x84b   :  { %793 = vrot.lane.b32.xlu1 %v785_v62, %s2098_s10  ;;  %v786_v2 = vmul.f32 %v782_v63, %v746_v26  ;;  %v783_v3 = vmul.f32 %v2049_v0, %v2277_v49 }
 0x84d   :  { %795 = vrot.lane.b32.xlu0 %v786_v2, %s2098_s10  ;;  %v787_v4 = vmul.f32 %v783_v3, %v747_v29 }
 0x84e   :  { %v2051_v5 = vpop.eup %2050 }
 0x84f   :  { %797 = vrot.lane.b32.xlu1 %v787_v4, %s2098_s10  ;;  %v784_v6 = vmul.f32 %v2051_v5, %v2284_v50 }
 0x851   :  { %811 = vperm.xlu0 %2003, %v781_v60   ;;  %v788_v7 = vmul.f32 %v784_v6, %v748_v35 }
 0x853   :  { %799 = vrot.lane.b32.xlu1 %v788_v7, %s2098_s10 }
 0x855   :  { %826 = vperm.xlu0 %2003, %v784_v6  }
 0x857   :  { %816 = vperm.xlu1 %2004, %v782_v63  }
 0x859   :  { %2006 = vset.pattern.permute.xlu0 %v2097_v20 }
 0x85b   :  { %821 = vperm.xlu1 %2004, %v783_v3  }
 0x85f   :  { %2005 = vset.pattern.permute.xlu1 %v2097_v20 }
 0x8bd   :  { %v794_v8 = vpop.permute.xlu1 %793 }
 0x8be   :  { %v805_v10 = vsub.f32 %v2266_v47, %v794_v8  ;;  %v872_v47 = vsel %vm368_vm7, %v1726_v22, 0 }
 0x8bf   :  { %v796_v11 = vpop.permute.xlu0 %795  ;;  %1906 = vmatpush3.bf16.msra.mxu0 %v872_v47 }
 0x8c0   :  { %v806_v15 = vsub.f32 %v2272_v48, %v796_v11  ;;  %835 = vperm.xlu1 %2005, %v805_v10   ;;  %v1729_v48 = vld [vmem:[%s2591_s3 + $0x70] sm:$0xf] }
 0x8c1   :  { %v798_v16 = vpop.permute.xlu1 %797  ;;  %1984 = vmatprep.subr.msk.bf16.mxu1 %vm368_vm7, %v1729_v48 }
 0x8c2   :  { %v807_v17 = vsub.f32 %v2277_v49, %v798_v16  ;;  %840 = vperm.xlu0 %2006, %v806_v15   ;;  %v926_v49 = vsel %vm368_vm7, %v1729_v48, 0  ;;  %v2033_v15 = vld [vmem:[%s2592_s4 + $0x48] sm:$0xff]   ;;  %v2034_v16 = vld [vmem:[%s2592_s4 + $0x50] sm:$0xff]  }
 0x8c3   :  { %1912 = vmatpush3.bf16.msra.mxu1 %v926_v49 }
 0x8c4   :  { %845 = vperm.xlu1 %2005, %v807_v17   ;;  %v2035_v17 = vld [vmem:[%s2592_s4 + $0x58] sm:$0xff]  }
 0x8c5   :  { %v800_v19 = vpop.permute.xlu1 %799 }
 0x8c6   :  { %v808_v21 = vsub.f32 %v2284_v50, %v800_v19  ;;  %2007 = vset.pattern.permute.xlu0 %v2095_v39  ;;  %v1732_v50 = vld [vmem:[%s2591_s3 + $0x80] sm:$0xf] }
 0x8c7   :  { %1985 = vmatprep.subr.msk.bf16.mxu0 %vm368_vm7, %v1732_v50  ;;  %v980_v44 = vsel %vm368_vm7, %v1732_v50, 0  ;;  %1057 = vperm.xlu0 %2007, %v2370_v45  }
 0x8c8   :  { %850 = vperm.xlu1 %2005, %v808_v21  }
 0x8cb   :  { %1072 = vperm.xlu0 %2007, %v2382_v51  }
 0x8cc   :  { %2008 = vset.pattern.permute.xlu1 %v2095_v39 }
 0x8cf   :  { %1082 = vperm.xlu0 %2007, %v2394_v53  }
 0x8d0   :  { %v812_v24 = vpop.permute.xlu0 %811 }
 0x8d1   :  { %v829_v27 = vmul.f32 %v812_v24, %v2293_v9 }
 0x8d3   :  { %1092 = vperm.xlu0 %2007, %v2406_v55  }
 0x8d4   :  { %v827_v26 = vpop.permute.xlu0 %826 }
 0x8d5   :  { %v832_v37 = vmul.f32 %v827_v26, %v2303_v18  ;;  %v2365_v18 = vld [vmem:[%s2593_s5 + $0x88] sm:$0xff] }
 0x8d6   :  { %v817_v23 = vpop.permute.xlu1 %816  ;;  %1062 = vperm.xlu1 %2008, %v2365_v18  }
 0x8d7   :  { %v830_v29 = vmul.f32 %v817_v23, %v2297_v14  ;;  %2010 = vset.pattern.permute.xlu0 %v2096_v13 }
 0x8da   :  { %v822_v25 = vpop.permute.xlu1 %821  ;;  %1067 = vperm.xlu1 %2008, %v2377_v46  }
 0x8db   :  { %v831_v34 = vmul.f32 %v822_v25, %v2295_v12  ;;  %v2032_v12 = vld [vmem:[%s2592_s4 + $0x40] sm:$0xff]  }
 0x8de   :  { %1077 = vperm.xlu1 %2008, %v2389_v52  }
 0x8e2   :  { %1087 = vperm.xlu1 %2008, %v2401_v54  }
 0x8e6   :  { %2009 = vset.pattern.permute.xlu1 %v2096_v13 }
 0x93f   :  { %v836_v28 = vpop.permute.xlu1 %835 }
 0x940   :  { %v853_v30 = vadd.f32 %v836_v28, %v829_v27 }
 0x941   :  { %v841_v31 = vpop.permute.xlu0 %840 }
 0x942   :  { %v854_v32 = vadd.f32 %v841_v31, %v830_v29  ;;  %v857_v35 = vmax.f32 %v853_v30, 0.0 }
 0x943   :  { %v846_v33 = vpop.permute.xlu1 %845 }
 0x944   :  { %v858_v36 = vmax.f32 %v854_v32, 0.0  ;;  %v855_v40 = vadd.f32 %v846_v33, %v831_v34 }
 0x946   :  { %v861_v38 = vpack.c.bf16 %v858_v36, %v857_v35  ;;  %v859_v9 = vmax.f32 %v855_v40, 0.0  ;;  %v1058_v21 = vpop.permute.xlu0 %1057 }
 0x947   :  { %v851_v41 = vpop.permute.xlu1 %850 }
 0x948   :  { %v856_v42 = vadd.f32 %v851_v41, %v832_v37  ;;  %1907 = vmatprep.mubr.msk.bf16.mxu0 %vm731_vm10, %v861_v38  ;;  %1913 = vmatprep.mubr.msk.bf16.mxu1 %vm731_vm10, %v861_v38 }
 0x94a   :  { %v860_v14 = vmax.f32 %v856_v42, 0.0  ;;  %v1073_v48 = vpop.permute.xlu0 %1072 }
 0x94c   :  { %v862_v43 = vpack.c.bf16 %v860_v14, %v859_v9 }
 0x94e   :  { %1908 = vmatmul.mubr.msk.bf16.vlgmr.msra.gmra.mrb[24].mxu0 %vm731_vm10, %v862_v43  ;;  %1914 = vmatmul.mubr.msk.bf16.vlgmr.msra.gmra.mrb[16].mxu1 %vm731_vm10, %v862_v43  ;;  %v1083_v31 = vpop.permute.xlu0 %1082 }
 0x94f   :  { %1919 = vmatprep.mubr.msk.bf16.mxu0 %vm731_vm10, %v861_v38  ;;  %1918 = vmatpush3.bf16.msra.mxu0 %v980_v44 }
 0x950   :  { %1935 = vmatprep.mubr.msk.bf16.mxu1 %vm1115_vm11, %v2032_v12 }
 0x952   :  { %v1093_v42 = vpop.permute.xlu0 %1092 }
 0x955   :  { %v1063_v19 = vpop.permute.xlu1 %1062 }
 0x956   :  { %1920 = vmatmul.mubr.msk.bf16.vlgmr.msra.gmra.mrb[28].mxu0 %vm731_vm10, %v862_v43 }
 0x959   :  { %v1068_v22 = vpop.permute.xlu1 %1067 }
 0x95d   :  { %v1078_v30 = vpop.permute.xlu1 %1077 }
 0x961   :  { %v1088_v41 = vpop.permute.xlu1 %1087 }
 0xa21   :  { %v1909_v56 = vpop.f32.mrb[24].mxu0  ;;  %v1915_v57 = vpop.f32.mrb[16].mxu1 }
 0xa22   :  { %v908_v58 = vpop.f32.mrb[25].mxu0  ;;  %v962_v59 = vpop.f32.mrb[17].mxu1 }
 0xa23   :  { %v1910_v60 = vpop.f32.mrb[26].mxu0  ;;  %v1916_v61 = vpop.f32.mrb[18].mxu1 }
 0xa24   :  { %v1032_v62 = vpack.c.bf16 %v1910_v60, %v1909_v56  ;;  %v1034_v63 = vpack.c.bf16 %v1916_v61, %v1915_v57  ;;  %v911_v0 = vpop.f32.mrb[27].mxu0  ;;  %v965_v2 = vpop.f32.mrb[19].mxu1 }
 0xa25   :  { %v1031_v3 = vpack.c.bf16 %v911_v0, %v908_v58  ;;  %v1033_v4 = vpack.c.bf16 %v965_v2, %v962_v59 }
 0xa27   :  { %1923 = vmatprep.subr.bf16.mxu1 %v1031_v3 }
 0xa28   :  { %1924 = vmatpush3.bf16.msra.mxu1 %v1031_v3 }
 0xa29   :  { %v1921_v5 = vpop.f32.mrb[28].mxu0  ;;  %1925 = vmatprep.subr.bf16.mxu1 %v1032_v62 }
 0xa2a   :  { %v1016_v6 = vpop.f32.mrb[29].mxu0 }
 0xa2b   :  { %v1922_v7 = vpop.f32.mrb[30].mxu0 }
 0xa2c   :  { %v1036_v8 = vpack.c.bf16 %v1922_v7, %v1921_v5  ;;  %v1019_v10 = vpop.f32.mrb[31].mxu0  ;;  %1926 = vmatpush3.bf16.msra.mxu1 %v1032_v62 }
 0xa2d   :  { %v1035_v11 = vpack.c.bf16 %v1019_v10, %v1016_v6  ;;  %1927 = vmatprep.subr.bf16.mxu1 %v1033_v4 }
 0xa30   :  { %1928 = vmatpush3.bf16.msra.mxu1 %v1033_v4 }
 0xa31   :  { %1929 = vmatprep.subr.bf16.mxu1 %v1034_v63 }
 0xa34   :  { %1930 = vmatpush3.bf16.msra.mxu1 %v1034_v63 }
 0xa35   :  { %1931 = vmatprep.subr.bf16.mxu1 %v1035_v11 }
 0xa38   :  { %1932 = vmatpush3.bf16.msra.mxu1 %v1035_v11 }
 0xa39   :  { %1933 = vmatprep.subr.bf16.mxu1 %v1036_v8 }
 0xa3c   :  { %1934 = vmatpush3.bf16.msra.mxu1 %v1036_v8 }
 0xa3d   :  { %1963 = vmatprep.subr.bf16.mxu1 %v2092_v1 }
 0xa3f   :  { %1936 = vmatmul.mubr.msk.bf16.vlgmr.msra.gmra.mrb[20].mxu1 %vm1115_vm11, %v2033_v15 }
 0xa40   :  { %1939 = vmatprep.mubr.msk.bf16.mxu1 %vm1115_vm11, %v2034_v16 }
 0xa47   :  { %1940 = vmatmul.mubr.msk.bf16.gmra.mrb[24].mxu1 %vm1115_vm11, %v2035_v17 }
 0xa48   :  { %1979 = vmatprep.mubr.msk.bf16.mxu1 %vm2093_vm0, %v2092_v1 }
 0xb12   :  { %v1937_v47 = vpop.f32.mrb[20].mxu1 }
 0xb13   :  { %v1162_v49 = vpop.f32.mrb[21].mxu1  ;;  %v2435_v28 = vadd.f32 %v1937_v47, %v1068_v22 }
 0xb14   :  { %v2427_v50 = vadd.f32 %v1162_v49, %v1058_v21  ;;  %v1938_v23 = vpop.f32.mrb[22].mxu1 }
 0xb15   :  { %v1165_v24 = vpop.f32.mrb[23].mxu1  ;;  %v2429_v25 = vadd.f32 %v1938_v23, %v1073_v48  ;;  %v1200_v37 = vsel %vm1193_vm12, %v2435_v28, 0.0 }
 0xb16   :  { %v2431_v26 = vadd.f32 %v1165_v24, %v1063_v19  ;;  %v1194_v27 = vsel %vm1193_vm12, %v2427_v50, 0.0 }
 0xb17   :  { %1195 = vadd.xlane.f32.xlu1 %v1194_v27  ;;  %v1203_v33 = vsel %vm1193_vm12, %v2429_v25, 0.0 }
 0xb18   :  { %v1197_v29 = vsel %vm1193_vm12, %v2431_v26, 0.0 }
 0xb19   :  { %1198 = vadd.xlane.f32.xlu0 %v1197_v29 }
 0xb1a   :  { %v1941_v32 = vpop.f32.mrb[24].mxu1 }
 0xb1b   :  { %v1178_v34 = vpop.f32.mrb[25].mxu1  ;;  %1204 = vadd.xlane.f32.xlu1 %v1203_v33  ;;  %v2447_v9 = vadd.f32 %v1941_v32, %v1088_v41 }
 0xb1c   :  { %v2441_v35 = vadd.f32 %v1178_v34, %v1078_v30  ;;  %v1942_v36 = vpop.f32.mrb[26].mxu1 }
 0xb1d   :  { %v1181_v38 = vpop.f32.mrb[27].mxu1  ;;  %1201 = vadd.xlane.f32.xlu0 %v1200_v37  ;;  %v2449_v14 = vadd.f32 %v1942_v36, %v1093_v42  ;;  %v1212_v12 = vsel %vm1193_vm12, %v2447_v9, 0.0 }
 0xb1e   :  { %v2445_v40 = vadd.f32 %v1181_v38, %v1083_v31  ;;  %v1206_v43 = vsel %vm1193_vm12, %v2441_v35, 0.0 }
 0xb1f   :  { %v1215_v56 = vsel %vm1193_vm12, %v2449_v14, 0.0 }
 0xb20   :  { %v1209_v44 = vsel %vm1193_vm12, %v2445_v40, 0.0 }
 0xb21   :  { %1207 = vadd.xlane.f32.xlu0 %v1206_v43  ;;  %1210 = vadd.xlane.f32.xlu1 %v1209_v44 }
 0xb25   :  { %1213 = vadd.xlane.f32.xlu0 %v1212_v12  ;;  %1216 = vadd.xlane.f32.xlu1 %v1215_v56 }
 0xba4   :  { %v1196_v57 = vpop.xlane.xlu1 %1195 }
 0xba5   :  { %v2459_v58 = vmul.f32 0.25, %v1196_v57 }
 0xba6   :  { %v1199_v59 = vpop.xlane.xlu0 %1198 }
 0xba7   :  { %v1227_v60 = vsub.f32 %v2427_v50, %v2459_v58  ;;  %v2463_v61 = vmul.f32 0.25, %v1199_v59 }
 0xba8   :  { %v1205_v62 = vpop.xlane.xlu1 %1204 }
 0xba9   :  { %v1228_v63 = vsub.f32 %v2431_v26, %v2463_v61  ;;  %v2467_v0 = vmul.f32 0.25, %v1205_v62  ;;  %v1235_v2 = vmul.f32 %v1227_v60, %v1227_v60 }
 0xbaa   :  { %v1202_v3 = vpop.xlane.xlu0 %1201 }
 0xbab   :  { %v1230_v4 = vsub.f32 %v2429_v25, %v2467_v0  ;;  %v2471_v5 = vmul.f32 0.25, %v1202_v3  ;;  %v1243_v6 = vsel %vm1193_vm12, %v1235_v2, 0.0  ;;  %v1236_v7 = vmul.f32 %v1228_v63, %v1228_v63 }
 0xbac   :  { %1244 = vadd.xlane.f32.xlu0 %v1243_v6 }
 0xbad   :  { %v1229_v8 = vsub.f32 %v2435_v28, %v2471_v5  ;;  %v1246_v10 = vsel %vm1193_vm12, %v1236_v7, 0.0  ;;  %v1238_v11 = vmul.f32 %v1230_v4, %v1230_v4 }
 0xbae   :  { %v1208_v15 = vpop.xlane.xlu0 %1207  ;;  %1247 = vadd.xlane.f32.xlu1 %v1246_v10  ;;  %v1211_v16 = vpop.xlane.xlu1 %1210 }
 0xbaf   :  { %v2477_v17 = vmul.f32 0.25, %v1208_v15  ;;  %v2479_v19 = vmul.f32 0.25, %v1211_v16  ;;  %v1237_v21 = vmul.f32 %v1229_v8, %v1229_v8  ;;  %v1252_v49 = vsel %vm1193_vm12, %v1238_v11, 0.0 }
 0xbb1   :  { %v1231_v22 = vsub.f32 %v2441_v35, %v2477_v17  ;;  %v1232_v47 = vsub.f32 %v2445_v40, %v2479_v19  ;;  %v1249_v48 = vsel %vm1193_vm12, %v1237_v21, 0.0 }
 0xbb2   :  { %v1214_v23 = vpop.xlane.xlu0 %1213  ;;  %1250 = vadd.xlane.f32.xlu0 %v1249_v48  ;;  %1253 = vadd.xlane.f32.xlu1 %v1252_v49  ;;  %v1217_v24 = vpop.xlane.xlu1 %1216 }
 0xbb3   :  { %v2487_v27 = vmul.f32 0.25, %v1214_v23  ;;  %v2489_v29 = vmul.f32 0.25, %v1217_v24  ;;  %v1239_v30 = vmul.f32 %v1231_v22, %v1231_v22  ;;  %v1240_v31 = vmul.f32 %v1232_v47, %v1232_v47 }
 0xbb5   :  { %v1233_v32 = vsub.f32 %v2447_v9, %v2487_v27  ;;  %v1234_v33 = vsub.f32 %v2449_v14, %v2489_v29  ;;  %v1255_v34 = vsel %vm1193_vm12, %v1239_v30, 0.0  ;;  %v1258_v36 = vsel %vm1193_vm12, %v1240_v31, 0.0 }
 0xbb6   :  { %1256 = vadd.xlane.f32.xlu0 %v1255_v34  ;;  %1259 = vadd.xlane.f32.xlu1 %v1258_v36 }
 0xbb7   :  { %v1241_v37 = vmul.f32 %v1233_v32, %v1233_v32  ;;  %v1242_v38 = vmul.f32 %v1234_v33, %v1234_v33 }
 0xbb9   :  { %v1261_v41 = vsel %vm1193_vm12, %v1241_v37, 0.0  ;;  %v1264_v42 = vsel %vm1193_vm12, %v1242_v38, 0.0 }
 0xbba   :  { %1262 = vadd.xlane.f32.xlu0 %v1261_v41  ;;  %1265 = vadd.xlane.f32.xlu1 %v1264_v42 }
 0xc39   :  { %v1245_v43 = vpop.xlane.xlu0 %1244 }
 0xc3a   :  { %v1267_v44 = vmul.f32 0.25, %v1245_v43 }
 0xc3b   :  { %v1248_v12 = vpop.xlane.xlu1 %1247 }
 0xc3c   :  { %v1275_v56 = vadd.f32 1e-05, %v1267_v44  ;;  %v1268_v57 = vmul.f32 0.25, %v1248_v12 }
 0xc3e   :  { %2052 = vrsqrt.f32 %v1275_v56  ;;  %v1276_v59 = vadd.f32 1e-05, %v1268_v57 }
 0xc3f   :  { %v1251_v60 = vpop.xlane.xlu0 %1250  ;;  %v1254_v62 = vpop.xlane.xlu1 %1253 }
 0xc40   :  { %2054 = vrsqrt.f32 %v1276_v59  ;;  %v1269_v63 = vmul.f32 0.25, %v1251_v60  ;;  %v1270_v2 = vmul.f32 0.25, %v1254_v62 }
 0xc42   :  { %v1277_v3 = vadd.f32 1e-05, %v1269_v63  ;;  %v1278_v4 = vadd.f32 1e-05, %v1270_v2 }
 0xc43   :  { %v1257_v6 = vpop.xlane.xlu0 %1256  ;;  %v1260_v7 = vpop.xlane.xlu1 %1259 }
 0xc44   :  { %2056 = vrsqrt.f32 %v1277_v3  ;;  %v1271_v8 = vmul.f32 0.25, %v1257_v6  ;;  %v1272_v10 = vmul.f32 0.25, %v1260_v7 }
 0xc45   :  { %2058 = vrsqrt.f32 %v1278_v4 }
 0xc46   :  { %v1279_v11 = vadd.f32 1e-05, %v1271_v8  ;;  %v1280_v15 = vadd.f32 1e-05, %v1272_v10 }
 0xc47   :  { %v1263_v16 = vpop.xlane.xlu0 %1262  ;;  %v1266_v21 = vpop.xlane.xlu1 %1265 }
 0xc48   :  { %v2053_v22 = vpop.eup %2052  ;;  %2060 = vrsqrt.f32 %v1279_v11  ;;  %v1273_v47 = vmul.f32 0.25, %v1263_v16  ;;  %v1274_v48 = vmul.f32 0.25, %v1266_v21  ;;  %v1455_v11 = vld [vmem:[%s2595_s7] sm:$0x3] }
 0xc49   :  { %2062 = vrsqrt.f32 %v1280_v15  ;;  %v1291_v49 = vmul.f32 %v2053_v22, %v2370_v45  ;;  %1986 = vmatprep.subr.msk.bf16.mxu0 %vm1468_vm13, %v1455_v11 }
 0xc4a   :  { %v2055_v23 = vpop.eup %2054  ;;  %v1281_v24 = vadd.f32 1e-05, %v1273_v47  ;;  %v1282_v30 = vadd.f32 1e-05, %v1274_v48 }
 0xc4b   :  { %v1299_v31 = vmul.f32 %v1291_v49, %v2459_v58  ;;  %v1292_v32 = vmul.f32 %v2055_v23, %v2365_v18 }
 0xc4c   :  { %2064 = vrsqrt.f32 %v1281_v24 }
 0xc4d   :  { %2066 = vrsqrt.f32 %v1282_v30  ;;  %1315 = vrot.lane.b32.xlu0 %v1299_v31, %s2098_s10  ;;  %v1300_v33 = vmul.f32 %v1292_v32, %v2463_v61 }
 0xc4e   :  { %v2057_v34 = vpop.eup %2056 }
 0xc4f   :  { %v2059_v36 = vpop.eup %2058  ;;  %1317 = vrot.lane.b32.xlu1 %v1300_v33, %s2098_s10  ;;  %v1293_v37 = vmul.f32 %v2057_v34, %v2377_v46 }
 0xc50   :  { %v1294_v38 = vmul.f32 %v2059_v36, %v2382_v51 }
 0xc51   :  { %v1301_v41 = vmul.f32 %v1293_v37, %v2471_v5 }
 0xc52   :  { %v2061_v42 = vpop.eup %2060  ;;  %v1302_v58 = vmul.f32 %v1294_v38, %v2467_v0 }
 0xc53   :  { %v2063_v43 = vpop.eup %2062  ;;  %1319 = vrot.lane.b32.xlu1 %v1301_v41, %s2098_s10  ;;  %v1295_v44 = vmul.f32 %v2061_v42, %v2389_v52 }
 0xc54   :  { %1321 = vrot.lane.b32.xlu0 %v1302_v58, %s2098_s10  ;;  %v1296_v61 = vmul.f32 %v2063_v43, %v2394_v53 }
 0xc55   :  { %v1303_v12 = vmul.f32 %v1295_v44, %v2477_v17 }
 0xc56   :  { %v2065_v56 = vpop.eup %2064  ;;  %v1304_v57 = vmul.f32 %v1296_v61, %v2479_v19 }
 0xc57   :  { %v2067_v59 = vpop.eup %2066  ;;  %1323 = vrot.lane.b32.xlu1 %v1303_v12, %s2098_s10  ;;  %v1297_v5 = vmul.f32 %v2065_v56, %v2401_v54 }
 0xc58   :  { %1325 = vrot.lane.b32.xlu0 %v1304_v57, %s2098_s10  ;;  %v1298_v0 = vmul.f32 %v2067_v59, %v2406_v55 }
 0xc59   :  { %v1305_v60 = vmul.f32 %v1297_v5, %v2487_v27 }
 0xc5a   :  { %v1306_v62 = vmul.f32 %v1298_v0, %v2489_v29 }
 0xc5b   :  { %1327 = vrot.lane.b32.xlu1 %v1305_v60, %s2098_s10 }
 0xc5c   :  { %1329 = vrot.lane.b32.xlu0 %v1306_v62, %s2098_s10 }
 0xc5f   :  { %1349 = vperm.xlu1 %2009, %v1291_v49  }
 0xc60   :  { %1354 = vperm.xlu0 %2010, %v1292_v32  }
 0xc63   :  { %1359 = vperm.xlu1 %2009, %v1293_v37  }
 0xc64   :  { %1374 = vperm.xlu0 %2010, %v1296_v61  }
 0xc67   :  { %1364 = vperm.xlu1 %2009, %v1294_v38  }
 0xc68   :  { %2012 = vset.pattern.permute.xlu0 %v2097_v20 }
 0xc6b   :  { %1369 = vperm.xlu1 %2009, %v1295_v44  }
 0xc6f   :  { %1379 = vperm.xlu1 %2009, %v1297_v5  }
 0xc73   :  { %2011 = vset.pattern.permute.xlu1 %v2097_v20 }
 0xcbf   :  { %v1316_v17 = vpop.permute.xlu0 %1315 }
 0xcc0   :  { %v1339_v19 = vsub.f32 %v2370_v45, %v1316_v17 }
 0xcc1   :  { %v1318_v27 = vpop.permute.xlu1 %1317 }
 0xcc2   :  { %1397 = vperm.xlu0 %2012, %v1339_v19   ;;  %v1340_v6 = vsub.f32 %v2365_v18, %v1318_v27 }
 0xcc5   :  { %v1320_v29 = vpop.permute.xlu1 %1319 }
 0xcc6   :  { %v1322_v63 = vpop.permute.xlu0 %1321  ;;  %v1341_v2 = vsub.f32 %v2377_v46, %v1320_v29  ;;  %v1470_v46 = vsel %vm1468_vm13, %v1455_v11, 0 }
 0xcc7   :  { %v1342_v3 = vsub.f32 %v2382_v51, %v1322_v63  ;;  %1944 = vmatpush3.bf16.msra.mxu0 %v1470_v46 }
 0xcc8   :  { %1407 = vperm.xlu1 %2011, %v1341_v2  }
 0xcc9   :  { %1412 = vperm.xlu0 %2012, %v1342_v3   ;;  %v1324_v4 = vpop.permute.xlu1 %1323 }
 0xcca   :  { %v1326_v7 = vpop.permute.xlu0 %1325  ;;  %v1343_v8 = vsub.f32 %v2389_v52, %v1324_v4 }
 0xccb   :  { %v1344_v18 = vsub.f32 %v2394_v53, %v1326_v7 }
 0xccc   :  { %1402 = vperm.xlu1 %2011, %v1340_v6  }
 0xccd   :  { %1417 = vperm.xlu0 %2012, %v1343_v8   ;;  %v1328_v51 = vpop.permute.xlu1 %1327 }
 0xcce   :  { %v1330_v10 = vpop.permute.xlu0 %1329  ;;  %v1345_v52 = vsub.f32 %v2401_v54, %v1328_v51 }
 0xccf   :  { %v1346_v45 = vsub.f32 %v2406_v55, %v1330_v10 }
 0xcd0   :  { %2013 = vset.pattern.permute.xlu1 %v2096_v13  ;;  %v1763_v13 = vld [vmem:[%s2595_s7 + $0x2] sm:$0x3] }
 0xcd1   :  { %1432 = vperm.xlu0 %2012, %v1346_v45   ;;  %1384 = vperm.xlu1 %2013, %v1298_v0   ;;  %v1540_v55 = vsel %vm1468_vm13, %v1763_v13, 0 }
 0xcd2   :  { %1987 = vmatprep.subr.msk.bf16.mxu0 %vm1468_vm13, %v1763_v13 }
 0xcd5   :  { %2014 = vset.pattern.permute.xlu1 %v2097_v20  ;;  %2016 = vset.pattern.permute.xlu0 %v2095_v39 }
 0xcd6   :  { %1422 = vperm.xlu1 %2014, %v1344_v18  }
 0xcda   :  { %1427 = vperm.xlu1 %2014, %v1345_v52  }
 0xcde   :  { %2015 = vset.pattern.permute.xlu1 %v2095_v39  ;;  %v1350_v53 = vpop.permute.xlu1 %1349 }
 0xcdf   :  { %v1355_v20 = vpop.permute.xlu0 %1354  ;;  %v1387_v24 = vmul.f32 %v1350_v53, %v2427_v50 }
 0xce0   :  { %v1388_v39 = vmul.f32 %v1355_v20, %v2431_v26 }
 0xce2   :  { %v1360_v15 = vpop.permute.xlu1 %1359 }
 0xce3   :  { %v1375_v22 = vpop.permute.xlu0 %1374  ;;  %v1389_v54 = vmul.f32 %v1360_v15, %v2435_v28 }
 0xce4   :  { %v1392_v50 = vmul.f32 %v1375_v22, %v2445_v40 }
 0xce6   :  { %v1365_v16 = vpop.permute.xlu1 %1364 }
 0xce7   :  { %v1390_v49 = vmul.f32 %v1365_v16, %v2429_v25 }
 0xcea   :  { %v1370_v21 = vpop.permute.xlu1 %1369 }
 0xceb   :  { %v1391_v25 = vmul.f32 %v1370_v21, %v2441_v35 }
 0xcee   :  { %v1380_v47 = vpop.permute.xlu1 %1379 }
 0xcef   :  { %v1393_v59 = vmul.f32 %v1380_v47, %v2447_v9  ;;  %v1616_v9 = vld [vmem:[%s2596_s8] sm:$0x3] }
 0xcf0   :  { %1619 = vperm.xlu1 %2015, %v1616_v9   ;;  %v1615_v47 = vld [vmem:[%s2594_s6] sm:$0x1] }
 0xd41   :  { %v1398_v48 = vpop.permute.xlu0 %1397 }
 0xd42   :  { %v1435_v33 = vadd.f32 %v1398_v48, %v1387_v24 }
 0xd44   :  { %v1443_v41 = vmax.f32 %v1435_v33, 0.0 }
 0xd47   :  { %v1408_v23 = vpop.permute.xlu1 %1407 }
 0xd48   :  { %v1413_v30 = vpop.permute.xlu0 %1412  ;;  %v1437_v32 = vadd.f32 %v1408_v23, %v1389_v54 }
 0xd49   :  { %v1438_v31 = vadd.f32 %v1413_v30, %v1390_v49 }
 0xd4a   :  { %v1445_v38 = vmax.f32 %v1437_v32, 0.0 }
 0xd4b   :  { %v1403_v34 = vpop.permute.xlu1 %1402  ;;  %v1446_v37 = vmax.f32 %v1438_v31, 0.0 }
 0xd4c   :  { %v1436_v36 = vadd.f32 %v1403_v34, %v1388_v39  ;;  %v1418_v44 = vpop.permute.xlu0 %1417 }
 0xd4d   :  { %v1452_v28 = vpack.c.bf16 %v1446_v37, %v1445_v38  ;;  %v1439_v26 = vadd.f32 %v1418_v44, %v1391_v25 }
 0xd4e   :  { %v1444_v42 = vmax.f32 %v1436_v36, 0.0 }
 0xd4f   :  { %v1447_v5 = vmax.f32 %v1439_v26, 0.0 }
 0xd50   :  { %v1451_v58 = vpack.c.bf16 %v1444_v42, %v1443_v41  ;;  %v1385_v43 = vpop.permute.xlu1 %1384  ;;  %v1433_v57 = vpop.permute.xlu0 %1432 }
 0xd51   :  { %v1394_v61 = vmul.f32 %v1385_v43, %v2449_v14 }
 0xd52   :  { %1945 = vmatprep.mubr.msk.bf16.mxu0 %vm1193_vm12, %v1451_v58 }
 0xd53   :  { %1946 = vmatmul.mubr.msk.bf16.vlgmr.msra.gmra.mrb[32].mxu0 %vm1193_vm12, %v1452_v28  ;;  %v1442_v0 = vadd.f32 %v1433_v57, %v1394_v61 }
 0xd54   :  { %1954 = vmatpush3.bf16.msra.mxu0 %v1540_v55 }
 0xd55   :  { %v1423_v12 = vpop.permute.xlu1 %1422  ;;  %v1450_v19 = vmax.f32 %v1442_v0, 0.0 }
 0xd56   :  { %v1440_v56 = vadd.f32 %v1423_v12, %v1392_v50 }
 0xd58   :  { %v1448_v60 = vmax.f32 %v1440_v56, 0.0 }
 0xd59   :  { %v1428_v62 = vpop.permute.xlu1 %1427 }
 0xd5a   :  { %v1453_v35 = vpack.c.bf16 %v1448_v60, %v1447_v5  ;;  %v1441_v17 = vadd.f32 %v1428_v62, %v1393_v59 }
 0xd5c   :  { %v1449_v27 = vmax.f32 %v1441_v17, 0.0  ;;  %1949 = vmatprep.mubr.msk.bf16.mxu0 %vm1193_vm12, %v1453_v35 }
 0xd5e   :  { %v1454_v40 = vpack.c.bf16 %v1450_v19, %v1449_v27 }
 0xd60   :  { %1950 = vmatmul.mubr.msk.bf16.gmra.mrb[36].mxu0 %vm1193_vm12, %v1454_v40 }
 0xd61   :  { %1955 = vmatprep.mubr.msk.bf16.mxu0 %vm1193_vm12, %v1451_v58 }
 0xd68   :  { %1956 = vmatmul.mubr.msk.bf16.vlgmr.msra.gmra.mrb[40].mxu0 %vm1193_vm12, %v1452_v28 }
 0xd69   :  { %1959 = vmatprep.mubr.msk.bf16.mxu0 %vm1193_vm12, %v1453_v35 }
 0xd6f   :  { %v1620_v48 = vpop.permute.xlu1 %1619 }
 0xd70   :  { %1960 = vmatmul.mubr.msk.bf16.gmra.mrb[44].mxu0 %vm1193_vm12, %v1454_v40 }
 0xe26   :  { %v1947_v14 = vpop.f32.mrb[32].mxu0 }
 0xe27   :  { %v1506_v29 = vpop.f32.mrb[33].mxu0 }
 0xe28   :  { %v1948_v63 = vpop.f32.mrb[34].mxu0 }
 0xe29   :  { %v1608_v2 = vpack.c.bf16 %v1948_v63, %v1947_v14  ;;  %v1509_v3 = vpop.f32.mrb[35].mxu0 }
 0xe2a   :  { %v1607_v4 = vpack.c.bf16 %v1509_v3, %v1506_v29 }
 0xe2c   :  { %1964 = vmatpush3.bf16.msra.mxu1 %v1607_v4 }
 0xe2d   :  { %1965 = vmatprep.subr.bf16.mxu1 %v2092_v1 }
 0xe30   :  { %1966 = vmatpush3.bf16.msra.mxu1 %v1608_v2 }
 0xe31   :  { %1967 = vmatprep.subr.bf16.mxu1 %v2092_v1 }
 0xe33   :  { %v1951_v6 = vpop.f32.mrb[36].mxu0 }
 0xe34   :  { %v1522_v7 = vpop.f32.mrb[37].mxu0 }
 0xe35   :  { %v1952_v8 = vpop.f32.mrb[38].mxu0 }
 0xe36   :  { %v1610_v10 = vpack.c.bf16 %v1952_v8, %v1951_v6  ;;  %v1525_v45 = vpop.f32.mrb[39].mxu0 }
 0xe37   :  { %v1609_v11 = vpack.c.bf16 %v1525_v45, %v1522_v7 }
 0xe39   :  { %1968 = vmatpush3.bf16.msra.mxu1 %v1609_v11 }
 0xe3a   :  { %1969 = vmatprep.subr.bf16.mxu1 %v2092_v1 }
 0xe3b   :  { %v1957_v46 = vpop.f32.mrb[40].mxu0 }
 0xe3c   :  { %v1576_v18 = vpop.f32.mrb[41].mxu0 }
 0xe3d   :  { %v1958_v51 = vpop.f32.mrb[42].mxu0  ;;  %1970 = vmatpush3.bf16.msra.mxu1 %v1610_v10 }
 0xe3e   :  { %v1612_v52 = vpack.c.bf16 %v1958_v51, %v1957_v46  ;;  %v1579_v13 = vpop.f32.mrb[43].mxu0  ;;  %1971 = vmatprep.subr.bf16.mxu1 %v2092_v1 }
 0xe3f   :  { %v1611_v55 = vpack.c.bf16 %v1579_v13, %v1576_v18 }
 0xe41   :  { %1972 = vmatpush3.bf16.msra.mxu1 %v1611_v55 }
 0xe42   :  { %1973 = vmatprep.subr.bf16.mxu1 %v2092_v1 }
 0xe43   :  { %v1961_v53 = vpop.f32.mrb[44].mxu0 }
 0xe44   :  { %v1592_v15 = vpop.f32.mrb[45].mxu0 }
 0xe45   :  { %v1962_v16 = vpop.f32.mrb[46].mxu0  ;;  %1974 = vmatpush3.bf16.msra.mxu1 %v1612_v52 }
 0xe46   :  { %v1614_v20 = vpack.c.bf16 %v1962_v16, %v1961_v53  ;;  %v1595_v21 = vpop.f32.mrb[47].mxu0  ;;  %1975 = vmatprep.subr.bf16.mxu1 %v2092_v1 }
 0xe47   :  { %v1613_v22 = vpack.c.bf16 %v1595_v21, %v1592_v15 }
 0xe49   :  { %1976 = vmatpush3.bf16.msra.mxu1 %v1613_v22 }
 0xe4a   :  { %1977 = vmatprep.subr.bf16.mxu1 %v2092_v1 }
 0xe4d   :  { %1978 = vmatpush3.bf16.msra.mxu1 %v1614_v20 }
 0xe50   :  { %1980 = vmatmul.mubr.bf16.vlgmr.msra.gmra.mrb[28].mxu1 %v1615_v47 }
 0xf23   :  { %v1656_v54 = vpop.f32.mrb[28].mxu1 }
 0xf24   :  { %v1981_v49 = vpop.f32.mrb[29].mxu1  ;;  %v1657_v23 = vadd.f32 %v1656_v54, %v1620_v48 }
 0xf25   :  { %v1659_v24 = vpop.f32.mrb[30].mxu1 }
 0xf26   :  { %v1982_v30 = vpop.f32.mrb[31].mxu1  ;;  %1663 = vst.msk [vmem:[#allocation2] sm:$0x3] %vm1662_vm14, %v1657_v23 }
 0xf27   :  { %2079 = shalt.err (!%p2076_p4)
}
 0xf28   :  { %s2080_s15 = scalar_lea.hbm %s2597_s9, 32 }
 0xf29   :  { %p2081_p5 = scmp.ne.s32.totalorder %s2597_s9, %s2080_s15  ;;  %p2084_p6 = scmp.lt.u32.totalorder %s2080_s15, %s2597_s9 }
 0xf2b   :  { %p2086_p7 = pnand %p2084_p6, %p2081_p5 }
 0xf2d   :  { %2089 = shalt.err (!%p2086_p7)
}
 0xf2e   :  { %1673 = dma.vmem_to_hbm [thread:$0]  %s1671_s0, 32, %s2597_s9, [#allocation3]  }
 0xf2f   :  { %2090 = dma.done.wait [#allocation3], 32  }
 0xf30   :  { %2091 = vsyncadd [#allocation3], 4294967264 }
 0xf31   :  { %1677 = vsyncpa [#allocation3], 1 }

</bundles_post_ra>
